<compile_context>
chip_gen: v7x
topology: tpu7x:2x2x1
jax: 0.10.0
libtpu: 0.0.40
codegen_flags: <defaults>
</compile_context>

<pallas_src>
import functools
import math

import jax
import jax.numpy as jnp
from jax.experimental import pallas as pl
from jax.experimental.pallas import tpu as pltpu

LANE = 128
MASK_VAL = -1e30  # large-negative finite (avoids inf-inf NaNs in online softmax)


def _round_up(x, m):
    return (x + m - 1) // m * m


def _pam_flash_kernel(xq_ref, xkv_ref, wq_ref, bq_ref, wkv_ref, bkv_ref,
                      gamma_ref, o_ref, q_s, m_s, l_s, acc_s,
                      *, n_valid, tk, c8p, masked):
    ki = pl.program_id(2)
    nk = pl.num_programs(2)

    @pl.when(ki == 0)
    def _init():
        # Query projection for this q-tile (done once, cached in scratch).
        xq = xq_ref[0]
        q_s[...] = (jnp.dot(xq, wq_ref[...],
                            preferred_element_type=jnp.float32)
                    + bq_ref[...])
        m_s[...] = jnp.full(m_s.shape, MASK_VAL, dtype=m_s.dtype)
        l_s[...] = jnp.zeros(l_s.shape, l_s.dtype)
        acc_s[...] = jnp.zeros(acc_s.shape, acc_s.dtype)

    # Fused key/value projection: one MXU pass over the kv x-tile, lane-aligned
    # slices (c8p is a multiple of 128).
    xkv = xkv_ref[0]
    kv = (jnp.dot(xkv, wkv_ref[...], preferred_element_type=jnp.float32)
          + bkv_ref[...])
    k = kv[:, :c8p]
    v = kv[:, c8p:]

    # energy[q, m] = <q_q, k_m>  -- contract channel dims directly (no k.T).
    energy = jax.lax.dot_general(
        q_s[...], k,
        dimension_numbers=(((1,), (1,)), ((), ())),
        preferred_element_type=jnp.float32)                    # (TQ, TK)

    if masked:  # static: only emitted when N was padded up to the tile grid
        kv_pos = ki * tk + jax.lax.broadcasted_iota(jnp.int32, energy.shape, 1)
        energy = jnp.where(kv_pos < n_valid, energy, MASK_VAL)

    # Online softmax update.
    m_prev = m_s[...]
    m_new = jnp.maximum(m_prev, jnp.max(energy, axis=-1, keepdims=True))
    alpha = jnp.exp(m_prev - m_new)
    p = jnp.exp(energy - m_new)
    l_s[...] = alpha * l_s[...] + jnp.sum(p, axis=-1, keepdims=True)
    acc_s[...] = alpha * acc_s[...] + jnp.dot(
        p.astype(v.dtype), v, preferred_element_type=jnp.float32)
    m_s[...] = m_new

    @pl.when(ki == nk - 1)
    def _finalize():
        inv_l = pl.reciprocal(l_s[...], approx=True)   # EUP slot, off the VALU path
        gamma = gamma_ref[0, 0]
        out = gamma * (acc_s[...] * inv_l) + xq_ref[0].astype(jnp.float32)
        o_ref[0] = out.astype(o_ref.dtype)


def pam_module_forward(x_nchw, wq, bq, wk, bk, wv, bv, gamma, *, tq=128, tk=128):
    """PAM forward.  x_nchw: (B, C, H, W); wq/wk: (C, C//8); wv: (C, C)."""
    B, C, H, W = x_nchw.shape
    N = H * W
    C8 = wq.shape[1]

    cp = _round_up(C, LANE)          # padded channel dim (lane-dense v / out)
    c8p = _round_up(C8, LANE)        # padded query/key dim (lane-dense q / k)
    npad = _round_up(N, math.lcm(tq, tk))

    # NCHW -> (B, N, C) channels-last (row-major spatial flatten matches
    # torch .view), then zero-pad N and C.  Zero pad columns/rows are inert in
    # every matmul; padded KV rows are masked inside the kernel.
    x_bnc = jnp.transpose(x_nchw.reshape(B, C, N), (0, 2, 1))
    x_p = jnp.pad(x_bnc, ((0, 0), (0, npad - N), (0, cp - C)))

    f32 = jnp.float32
    wq_p = jnp.pad(wq, ((0, cp - C), (0, c8p - C8)))
    bq_p = jnp.pad(bq.reshape(1, C8), ((0, 0), (0, c8p - C8))).astype(f32)
    wk_p = jnp.pad(wk, ((0, cp - C), (0, c8p - C8)))
    bk_p = jnp.pad(bk.reshape(1, C8), ((0, 0), (0, c8p - C8))).astype(f32)
    wv_p = jnp.pad(wv, ((0, cp - C), (0, cp - C)))
    bv_p = jnp.pad(bv.reshape(1, C), ((0, 0), (0, cp - C))).astype(f32)

    wkv = jnp.concatenate([wk_p, wv_p], axis=1)        # (cp, c8p + cp)
    bkv = jnp.concatenate([bk_p, bv_p], axis=1)        # (1, c8p + cp)
    gamma2 = jnp.asarray(gamma, f32).reshape(1, 1)

    kernel = functools.partial(
        _pam_flash_kernel, n_valid=N, tk=tk, c8p=c8p, masked=(npad != N))

    out_p = pl.pallas_call(
        kernel,
        out_shape=jax.ShapeDtypeStruct((B, npad, cp), x_bnc.dtype),
        grid_spec=pltpu.PrefetchScalarGridSpec(
            num_scalar_prefetch=0,
            grid=(B, npad // tq, npad // tk),
            in_specs=[
                pl.BlockSpec((1, tq, cp), lambda b, qi, ki: (b, qi, 0)),   # x (q tile)
                pl.BlockSpec((1, tk, cp), lambda b, qi, ki: (b, ki, 0)),   # x (kv tile)
                pl.BlockSpec((cp, c8p), lambda b, qi, ki: (0, 0)),         # Wq (padded)
                pl.BlockSpec((1, c8p), lambda b, qi, ki: (0, 0)),          # bq
                pl.BlockSpec((cp, c8p + cp), lambda b, qi, ki: (0, 0)),    # [Wk | Wv]
                pl.BlockSpec((1, c8p + cp), lambda b, qi, ki: (0, 0)),     # [bk | bv]
                pl.BlockSpec(memory_space=pltpu.MemorySpace.SMEM),         # gamma
            ],
            out_specs=pl.BlockSpec((1, tq, cp), lambda b, qi, ki: (b, qi, 0)),
            scratch_shapes=[
                pltpu.VMEM((tq, c8p), jnp.float32),   # cached q projection
                pltpu.VMEM((tq, 1), jnp.float32),     # running max
                pltpu.VMEM((tq, 1), jnp.float32),     # running sum
                pltpu.VMEM((tq, cp), jnp.float32),    # output accumulator
            ]),
        compiler_params=pltpu.CompilerParams(
            dimension_semantics=("parallel", "parallel", "arbitrary"),
            vmem_limit_bytes=64 * 1024 * 1024),
    )(x_p, x_p, wq_p, bq_p, wkv, bkv, gamma2)

    out_bnc = out_p[:, :N, :C]
    return jnp.transpose(out_bnc, (0, 2, 1)).reshape(B, C, H, W)


def pam_reference(x_nchw, wq, bq, wk, bk, wv, bv, gamma):
    """Pure-JAX reference mirroring the PyTorch forward."""
    B, C, H, W = x_nchw.shape
    N = H * W
    x_flat = x_nchw.reshape(B, C, N)                                   # (B, C, N)
    q = jnp.einsum('oc,bcn->bon', wq.T, x_flat) + bq[None, :, None]    # (B, C8, N)
    k = jnp.einsum('oc,bcn->bon', wk.T, x_flat) + bk[None, :, None]
    v = jnp.einsum('oc,bcn->bon', wv.T, x_flat) + bv[None, :, None]    # (B, C, N)
    energy = jnp.einsum('bqn,bqm->bnm', q, k)                          # (B, N, N)
    attn = jax.nn.softmax(energy, axis=-1)
    out = jnp.einsum('bcm,bnm->bcn', v, attn)                          # (B, C, N)
    out = out.reshape(B, C, H, W)
    return gamma * out + x_nchw


if __name__ == "__main__":
    key = jax.random.PRNGKey(0)

    def run_case(B, C, H, W, gamma_val, case_key):
        C8 = C // 8
        ks = jax.random.split(case_key, 7)
        x = jax.random.normal(ks[0], (B, C, H, W), jnp.float32)
        wq = 0.1 * jax.random.normal(ks[1], (C, C8), jnp.float32)
        bq = 0.1 * jax.random.normal(ks[2], (C8,), jnp.float32)
        wk = 0.1 * jax.random.normal(ks[3], (C, C8), jnp.float32)
        bk = 0.1 * jax.random.normal(ks[4], (C8,), jnp.float32)
        wv = 0.1 * jax.random.normal(ks[5], (C, C), jnp.float32)
        bv = 0.1 * jax.random.normal(ks[6], (C,), jnp.float32)
        gamma = jnp.float32(gamma_val)

        out = jax.block_until_ready(
            pam_module_forward(x, wq, bq, wk, bk, wv, bv, gamma))
        ref = pam_reference(x, wq, bq, wk, bk, wv, bv, gamma)
        assert out.shape == (B, C, H, W)
        # slightly loose tolerance: pl.reciprocal(approx=True) in the finalize
        err = float(jnp.max(jnp.abs(out - ref)))
        assert jnp.allclose(out, ref, atol=2e-3, rtol=2e-3), err
        return out

    k1, k2, k3 = jax.random.split(key, 3)
    # N = 256 (exact multiple of the 128 tiles), multi-tile q and kv axes.
    run_case(2, 16, 16, 16, 0.7, k1)
    # gamma = 0 (the PyTorch init): output must reduce to the residual input.
    run_case(1, 16, 16, 16, 0.0, k2)
    # N = 144 (not a tile multiple) and C8 = 3: exercises the KV-padding mask
    # and the channel / query-dim lane padding.
    run_case(2, 24, 12, 12, 0.5, k3)

    print("KERNEL_OK")
</pallas_src>

<mosaic_0001>
module attributes {stable_mosaic.version = 11 : i64} {
  func.func @_pam_flash_kernel(%arg0: i32, %arg1: i32, %arg2: i32, %arg3: memref<1x128x128xf32, #tpu.memory_space<vmem>>, %arg4: memref<1x128x128xf32, #tpu.memory_space<vmem>>, %arg5: memref<128x128xf32, #tpu.memory_space<vmem>>, %arg6: memref<1x128xf32, #tpu.memory_space<vmem>>, %arg7: memref<128x256xf32, #tpu.memory_space<vmem>>, %arg8: memref<1x256xf32, #tpu.memory_space<vmem>>, %arg9: memref<1x1xf32, #tpu.memory_space<smem>>, %arg10: memref<1x128x128xf32, #tpu.memory_space<vmem>>, %arg11: memref<128x128xf32, #tpu.memory_space<vmem>>, %arg12: memref<128x1xf32, #tpu.memory_space<vmem>>, %arg13: memref<128x1xf32, #tpu.memory_space<vmem>>, %arg14: memref<128x128xf32, #tpu.memory_space<vmem>>) attributes {dimension_semantics = [#tpu.dimension_semantics<parallel>, #tpu.dimension_semantics<parallel>, #tpu.dimension_semantics<arbitrary>], iteration_bounds = array<i64: 2, 2, 2>, scalar_prefetch = 0 : i64, scratch_operands = 4 : i64, tpu.core_type = #tpu.core_type<tc>, window_params = [{transform_indices = @transform_0, window_bounds = array<i64: 1, 128, 128>}, {transform_indices = @transform_1, window_bounds = array<i64: 1, 128, 128>}, {pipeline_mode = #tpu.pipeline_mode<synchronous>, transform_indices = @transform_2, window_bounds = array<i64: 128, 128>}, {pipeline_mode = #tpu.pipeline_mode<synchronous>, transform_indices = @transform_3, window_bounds = array<i64: 1, 128>}, {pipeline_mode = #tpu.pipeline_mode<synchronous>, transform_indices = @transform_4, window_bounds = array<i64: 128, 256>}, {pipeline_mode = #tpu.pipeline_mode<synchronous>, transform_indices = @transform_5, window_bounds = array<i64: 1, 256>}, {transform_indices = @transform_6, window_bounds = array<i64: 1, 1>}, {transform_indices = @transform_7, window_bounds = array<i64: 1, 128, 128>}]} {
    %c0_i32 = arith.constant 0 : i32
    %0 = arith.cmpi eq, %arg2, %c0_i32 : i32
    %1 = arith.extui %0 : i1 to i32
    %c0_i32_0 = arith.constant 0 : i32
    %2 = arith.cmpi ne, %1, %c0_i32_0 : i32
    scf.if %2 {
      %c0_26 = arith.constant 0 : index
      %c0_27 = arith.constant 0 : index
      %c0_28 = arith.constant 0 : index
      %39 = vector.load %arg3[%c0_26, %c0_27, %c0_28] : memref<1x128x128xf32, #tpu.memory_space<vmem>>, vector<1x128x128xf32>
      %40 = vector.shape_cast %39 : vector<1x128x128xf32> to vector<128x128xf32>
      %c0_29 = arith.constant 0 : index
      %c0_30 = arith.constant 0 : index
      %41 = vector.load %arg5[%c0_29, %c0_30] : memref<128x128xf32, #tpu.memory_space<vmem>>, vector<128x128xf32>
      %cst_31 = arith.constant dense<0.000000e+00> : vector<128x128xf32>
      %42 = tpu.matmul %40, %41, %cst_31 {dimension_numbers = #tpu.dot_dimension_numbers<[1], [0], [0], [1], [0, 0, 1, 1], [], []>} : vector<128x128xf32>, vector<128x128xf32>, vector<128x128xf32> -> vector<128x128xf32>
      %c0_32 = arith.constant 0 : index
      %c0_33 = arith.constant 0 : index
      %43 = vector.load %arg6[%c0_32, %c0_33] : memref<1x128xf32, #tpu.memory_space<vmem>>, vector<1x128xf32>
      %44 = vector.broadcast %43 : vector<1x128xf32> to vector<128x128xf32>
      %45 = arith.addf %42, %44 : vector<128x128xf32>
      %c0_34 = arith.constant 0 : index
      %c0_35 = arith.constant 0 : index
      %46 = vector.load %arg11[%c0_34, %c0_35] : memref<128x128xf32, #tpu.memory_space<vmem>>, vector<128x128xf32>
      tpu.vector_store %arg11[%c0_34, %c0_35], %45 {strides = array<i32>} : memref<128x128xf32, #tpu.memory_space<vmem>>, vector<128x128xf32>,
      %cst_36 = arith.constant -1.000000e+30 : f32
      %47 = vector.broadcast %cst_36 : f32 to vector<128x1xf32>
      %c0_37 = arith.constant 0 : index
      %c0_38 = arith.constant 0 : index
      %48 = vector.load %arg12[%c0_37, %c0_38] : memref<128x1xf32, #tpu.memory_space<vmem>>, vector<128x1xf32>
      tpu.vector_store %arg12[%c0_37, %c0_38], %47 {strides = array<i32>} : memref<128x1xf32, #tpu.memory_space<vmem>>, vector<128x1xf32>,
      %cst_39 = arith.constant 0.000000e+00 : f32
      %49 = vector.broadcast %cst_39 : f32 to vector<128x1xf32>
      %c0_40 = arith.constant 0 : index
      %c0_41 = arith.constant 0 : index
      %50 = vector.load %arg13[%c0_40, %c0_41] : memref<128x1xf32, #tpu.memory_space<vmem>>, vector<128x1xf32>
      tpu.vector_store %arg13[%c0_40, %c0_41], %49 {strides = array<i32>} : memref<128x1xf32, #tpu.memory_space<vmem>>, vector<128x1xf32>,
      %cst_42 = arith.constant 0.000000e+00 : f32
      %51 = vector.broadcast %cst_42 : f32 to vector<128x128xf32>
      %c0_43 = arith.constant 0 : index
      %c0_44 = arith.constant 0 : index
      %52 = vector.load %arg14[%c0_43, %c0_44] : memref<128x128xf32, #tpu.memory_space<vmem>>, vector<128x128xf32>
      tpu.vector_store %arg14[%c0_43, %c0_44], %51 {strides = array<i32>} : memref<128x128xf32, #tpu.memory_space<vmem>>, vector<128x128xf32>,
    } else {
    }
    %c0 = arith.constant 0 : index
    %c0_1 = arith.constant 0 : index
    %c0_2 = arith.constant 0 : index
    %3 = vector.load %arg4[%c0, %c0_1, %c0_2] : memref<1x128x128xf32, #tpu.memory_space<vmem>>, vector<1x128x128xf32>
    %4 = vector.shape_cast %3 : vector<1x128x128xf32> to vector<128x128xf32>
    %c0_3 = arith.constant 0 : index
    %c0_4 = arith.constant 0 : index
    %5 = vector.load %arg7[%c0_3, %c0_4] : memref<128x256xf32, #tpu.memory_space<vmem>>, vector<128x256xf32>
    %cst = arith.constant dense<0.000000e+00> : vector<128x256xf32>
    %6 = tpu.matmul %4, %5, %cst {dimension_numbers = #tpu.dot_dimension_numbers<[1], [0], [0], [1], [0, 0, 1, 1], [], []>} : vector<128x128xf32>, vector<128x256xf32>, vector<128x256xf32> -> vector<128x256xf32>
    %c0_5 = arith.constant 0 : index
    %c0_6 = arith.constant 0 : index
    %7 = vector.load %arg8[%c0_5, %c0_6] : memref<1x256xf32, #tpu.memory_space<vmem>>, vector<1x256xf32>
    %8 = vector.broadcast %7 : vector<1x256xf32> to vector<128x256xf32>
    %9 = arith.addf %6, %8 : vector<128x256xf32>
    %10 = vector.extract_strided_slice %9 {offsets = [0, 0], sizes = [128, 128], strides = [1, 1]} : vector<128x256xf32> to vector<128x128xf32>
    %11 = vector.extract_strided_slice %9 {offsets = [0, 128], sizes = [128, 128], strides = [1, 1]} : vector<128x256xf32> to vector<128x128xf32>
    %c0_7 = arith.constant 0 : index
    %c0_8 = arith.constant 0 : index
    %12 = vector.load %arg11[%c0_7, %c0_8] : memref<128x128xf32, #tpu.memory_space<vmem>>, vector<128x128xf32>
    %cst_9 = arith.constant dense<0.000000e+00> : vector<128x128xf32>
    %13 = tpu.matmul %12, %10, %cst_9 {dimension_numbers = #tpu.dot_dimension_numbers<[1], [1], [0], [0], [0, 0, 1, 0], [], []>} : vector<128x128xf32>, vector<128x128xf32>, vector<128x128xf32> -> vector<128x128xf32>
    %c0_10 = arith.constant 0 : index
    %c0_11 = arith.constant 0 : index
    %14 = vector.load %arg12[%c0_10, %c0_11] : memref<128x1xf32, #tpu.memory_space<vmem>>, vector<128x1xf32>
    %cst_12 = arith.constant dense<0xFF800000> : vector<128xf32>
    %15 = vector.multi_reduction <maximumf>, %13, %cst_12 [1] : vector<128x128xf32> to vector<128xf32>
    %16 = vector.shape_cast %15 : vector<128xf32> to vector<128x1xf32>
    %17 = arith.maximumf %14, %16 : vector<128x1xf32>
    %18 = arith.subf %14, %17 : vector<128x1xf32>
    %19 = math.exp %18 : vector<128x1xf32>
    %20 = vector.broadcast %17 : vector<128x1xf32> to vector<128x128xf32>
    %21 = arith.subf %13, %20 : vector<128x128xf32>
    %22 = math.exp %21 : vector<128x128xf32>
    %c0_13 = arith.constant 0 : index
    %c0_14 = arith.constant 0 : index
    %23 = vector.load %arg13[%c0_13, %c0_14] : memref<128x1xf32, #tpu.memory_space<vmem>>, vector<128x1xf32>
    %24 = arith.mulf %19, %23 : vector<128x1xf32>
    %cst_15 = arith.constant dense<0.000000e+00> : vector<128xf32>
    %25 = vector.multi_reduction <add>, %22, %cst_15 [1] : vector<128x128xf32> to vector<128xf32>
    %26 = vector.shape_cast %25 : vector<128xf32> to vector<128x1xf32>
    %27 = arith.addf %24, %26 : vector<128x1xf32>
    %c0_16 = arith.constant 0 : index
    %c0_17 = arith.constant 0 : index
    %28 = vector.load %arg13[%c0_16, %c0_17] : memref<128x1xf32, #tpu.memory_space<vmem>>, vector<128x1xf32>
    tpu.vector_store %arg13[%c0_16, %c0_17], %27 {strides = array<i32>} : memref<128x1xf32, #tpu.memory_space<vmem>>, vector<128x1xf32>,
    %c0_18 = arith.constant 0 : index
    %c0_19 = arith.constant 0 : index
    %29 = vector.load %arg14[%c0_18, %c0_19] : memref<128x128xf32, #tpu.memory_space<vmem>>, vector<128x128xf32>
    %30 = vector.broadcast %19 : vector<128x1xf32> to vector<128x128xf32>
    %31 = arith.mulf %30, %29 : vector<128x128xf32>
    %cst_20 = arith.constant dense<0.000000e+00> : vector<128x128xf32>
    %32 = tpu.matmul %22, %11, %cst_20 {dimension_numbers = #tpu.dot_dimension_numbers<[1], [0], [0], [1], [0, 0, 1, 1], [], []>} : vector<128x128xf32>, vector<128x128xf32>, vector<128x128xf32> -> vector<128x128xf32>
    %33 = arith.addf %31, %32 : vector<128x128xf32>
    %c0_21 = arith.constant 0 : index
    %c0_22 = arith.constant 0 : index
    %34 = vector.load %arg14[%c0_21, %c0_22] : memref<128x128xf32, #tpu.memory_space<vmem>>, vector<128x128xf32>
    tpu.vector_store %arg14[%c0_21, %c0_22], %33 {strides = array<i32>} : memref<128x128xf32, #tpu.memory_space<vmem>>, vector<128x128xf32>,
    %c0_23 = arith.constant 0 : index
    %c0_24 = arith.constant 0 : index
    %35 = vector.load %arg12[%c0_23, %c0_24] : memref<128x1xf32, #tpu.memory_space<vmem>>, vector<128x1xf32>
    tpu.vector_store %arg12[%c0_23, %c0_24], %17 {strides = array<i32>} : memref<128x1xf32, #tpu.memory_space<vmem>>, vector<128x1xf32>,
    %c1_i32 = arith.constant 1 : i32
    %36 = arith.cmpi eq, %arg2, %c1_i32 : i32
    %37 = arith.extui %36 : i1 to i32
    %c0_i32_25 = arith.constant 0 : i32
    %38 = arith.cmpi ne, %37, %c0_i32_25 : i32
    scf.if %38 {
      %c0_26 = arith.constant 0 : index
      %c0_27 = arith.constant 0 : index
      %39 = vector.load %arg13[%c0_26, %c0_27] : memref<128x1xf32, #tpu.memory_space<vmem>>, vector<128x1xf32>
      %40 = tpu.reciprocal %39 {approx = true} : vector<128x1xf32> -> vector<128x1xf32>
      %c0_28 = arith.constant 0 : index
      %c0_29 = arith.constant 0 : index
      %41 = memref.load %arg9[%c0_28, %c0_29] : memref<1x1xf32, #tpu.memory_space<smem>>
      %c0_30 = arith.constant 0 : index
      %c0_31 = arith.constant 0 : index
      %42 = vector.load %arg14[%c0_30, %c0_31] : memref<128x128xf32, #tpu.memory_space<vmem>>, vector<128x128xf32>
      %43 = vector.broadcast %40 : vector<128x1xf32> to vector<128x128xf32>
      %44 = arith.mulf %42, %43 : vector<128x128xf32>
      %45 = vector.broadcast %41 : f32 to vector<128x128xf32>
      %46 = arith.mulf %45, %44 : vector<128x128xf32>
      %c0_32 = arith.constant 0 : index
      %c0_33 = arith.constant 0 : index
      %c0_34 = arith.constant 0 : index
      %47 = vector.load %arg3[%c0_32, %c0_33, %c0_34] : memref<1x128x128xf32, #tpu.memory_space<vmem>>, vector<1x128x128xf32>
      %48 = vector.shape_cast %47 : vector<1x128x128xf32> to vector<128x128xf32>
      %49 = arith.addf %46, %48 : vector<128x128xf32>
      %c0_35 = arith.constant 0 : index
      %c0_36 = arith.constant 0 : index
      %c0_37 = arith.constant 0 : index
      %50 = vector.load %arg10[%c0_35, %c0_36, %c0_37] : memref<1x128x128xf32, #tpu.memory_space<vmem>>, vector<1x128x128xf32>
      %51 = vector.shape_cast %50 : vector<1x128x128xf32> to vector<128x128xf32>
      %52 = vector.shape_cast %49 : vector<128x128xf32> to vector<1x128x128xf32>
      tpu.vector_store %arg10[%c0_35, %c0_36, %c0_37], %52 {strides = array<i32>} : memref<1x128x128xf32, #tpu.memory_space<vmem>>, vector<1x128x128xf32>,
    } else {
    }
    return
  }
  func.func @transform_0(%arg0: i32, %arg1: i32, %arg2: i32) -> (i32, i32, i32) {
    %c0_i32 = arith.constant 0 : i32
    %c0_i32_0 = arith.constant 0 : i32
    return %arg0, %arg1, %c0_i32 : i32, i32, i32
  }
  func.func @transform_1(%arg0: i32, %arg1: i32, %arg2: i32) -> (i32, i32, i32) {
    %c0_i32 = arith.constant 0 : i32
    %c0_i32_0 = arith.constant 0 : i32
    return %arg0, %arg2, %c0_i32 : i32, i32, i32
  }
  func.func @transform_2(%arg0: i32, %arg1: i32, %arg2: i32) -> (i32, i32) {
    %c0_i32 = arith.constant 0 : i32
    %c0_i32_0 = arith.constant 0 : i32
    %c0_i32_1 = arith.constant 0 : i32
    return %c0_i32, %c0_i32_0 : i32, i32
  }
  func.func @transform_3(%arg0: i32, %arg1: i32, %arg2: i32) -> (i32, i32) {
    %c0_i32 = arith.constant 0 : i32
    %c0_i32_0 = arith.constant 0 : i32
    %c0_i32_1 = arith.constant 0 : i32
    return %c0_i32, %c0_i32_0 : i32, i32
  }
  func.func @transform_4(%arg0: i32, %arg1: i32, %arg2: i32) -> (i32, i32) {
    %c0_i32 = arith.constant 0 : i32
    %c0_i32_0 = arith.constant 0 : i32
    %c0_i32_1 = arith.constant 0 : i32
    return %c0_i32, %c0_i32_0 : i32, i32
  }
  func.func @transform_5(%arg0: i32, %arg1: i32, %arg2: i32) -> (i32, i32) {
    %c0_i32 = arith.constant 0 : i32
    %c0_i32_0 = arith.constant 0 : i32
    %c0_i32_1 = arith.constant 0 : i32
    return %c0_i32, %c0_i32_0 : i32, i32
  }
  func.func @transform_6(%arg0: i32, %arg1: i32, %arg2: i32) -> (i32, i32) {
    %c0_i32 = arith.constant 0 : i32
    %c0_i32_0 = arith.constant 0 : i32
    %c0_i32_1 = arith.constant 0 : i32
    return %c0_i32, %c0_i32_0 : i32, i32
  }
  func.func @transform_7(%arg0: i32, %arg1: i32, %arg2: i32) -> (i32, i32, i32) {
    %c0_i32 = arith.constant 0 : i32
    %c0_i32_0 = arith.constant 0 : i32
    return %arg0, %arg1, %c0_i32 : i32, i32, i32
  }
}

</mosaic_0001>

<bundles_post_ra>
// kernel: tpu_custom_call.1
= control target key start
LH: loop header
LB: loop body
LE: loop exit
PB: predicated region body
PF: predicated region fallthrough
CT: control target
= control target key end

     0   :  { %s4204_s0 = inlined_call_operand.hbm [shape: f32[2,256,128], index: 0, kind: input, shape index: {}]   ;;  %s4205_s1 = inlined_call_operand.hbm [shape: f32[2,256,128], index: 1, kind: input, shape index: {}]   ;;  %s4206_s2 = inlined_call_operand.hbm [shape: f32[128,128], index: 2, kind: input, shape index: {}]   ;;  %s4207_s3 = inlined_call_operand.hbm [shape: f32[1,128], index: 3, kind: input, shape index: {}]   ;;  %s4208_s4 = inlined_call_operand.hbm [shape: f32[128,256], index: 4, kind: input, shape index: {}]   ;;  %s4209_s5 = inlined_call_operand.hbm [shape: f32[1,256], index: 5, kind: input, shape index: {}]   ;;  %s4210_s6 = inlined_call_operand.<no memory space> [shape: f32[1,1], index: 6, kind: input, shape index: {}]   ;;  %s4211_s7 = inlined_call_operand.hbm [shape: f32[2,256,128], index: 7, kind: output, shape index: {}]  }
   0x1   :  { %4230 = sst [smem:[#allocation34_spill]] %s4206_s2 }
   0x2   :  { %4231 = sst [smem:[#allocation35_spill]] %s4207_s3 }
   0x3   :  { %4232 = sst [smem:[#allocation36_spill]] %s4208_s4 }
   0x4   :  { %4233 = sst [smem:[#allocation37_spill]] %s4209_s5 }
   0x5   :  { %4234 = sst [smem:[#allocation38_spill]] %s4211_s7 }
   0x6   :  { %12 = sst [smem:[#allocation6]] %s4210_s6 }
   0x7   :  { %13 = vsyncpa [#allocation8], 0 }
   0x8   :  { %15 = vsyncpa [#allocation8 + $0x1], 0 }
   0x9   :  { %16 = vsyncpa [#allocation11], 0 }
   0xa   :  { %18 = vsyncpa [#allocation11 + $0x1], 0 }
   0xb   :  { %19 = vsyncpa [#allocation14], 0 }
   0xc   :  { %20 = vsyncpa [#allocation17], 0 }
   0xd   :  { %21 = vsyncpa [#allocation9], 0 }
   0xe   :  { %23 = vsyncpa [#allocation9 + $0x1], 0  ;;  %s3212_s26 = smov 0   ;;  %s3214_s27 = smov 0  }
   0xf   :  { %s3216_s28 = smov 0   ;;  %s3218_s29 = smov 0  }
  0x10   :  { %s3220_s30 = smov 0   ;;  %s3222_s8 = smov 0  }
  0x11   :  { %s3224_s6 = smov 0   ;;  %s3226_s9 = smov 0  }
  0x12   :  { %s3228_s10 = smov 0   ;;  %s3230_s11 = smov 0  }
  0x13   :  { %s3232_s12 = smov 0   ;;  %s3234_s13 = smov 0  }
  0x14   :  { %s3236_s14 = smov 0  }
  0x15 LB: > { %4235 = sst [smem:[#allocation25_spill]] %s3113_s29  ;;  %s3276_s15 = sadd.s32 4294967295, %s3149_s14   ;;  %s3149_s14 = sphi %s3236_s14, %s29_s14   ;;  %s3145_s13 = sphi %s3234_s13, %s4298_s13   ;;  %s3141_s12 = sphi %s3232_s12, %s4297_s12   ;;  %s3137_s11 = sphi %s3230_s11, %s4296_s11   ;;  %s3133_s10 = sphi %s3228_s10, %s4295_s10   ;;  %s3129_s9 = sphi %s3226_s9, %s4294_s9   ;;  %s3125_s6 = sphi %s3224_s6, %s4293_s6   ;;  %s3121_s8 = sphi %s3222_s8, %s4292_s8   ;;  %s3117_s30 = sphi %s3220_s30, %s4291_s30   ;;  %s3113_s29 = sphi %s3218_s29, %s4290_s29   ;;  %s3109_s28 = sphi %s3216_s28, %s4289_s28   ;;  %s3105_s27 = sphi %s3214_s27, %s4288_s27   ;;  %s3101_s26 = sphi %s3212_s26, %s4287_s26  }
  0x16   : > { %4236 = sst [smem:[#allocation26_spill]] %s3125_s6  ;;  %p98_p0 = scmp.ne.s32.totalorder %s3105_s27, %s3101_s26 }
  0x17   : > { %4237 = sst [smem:[#allocation27_spill]] %s3129_s9  ;;  %p4213_p1 = scmp.eq.s32.totalorder %s3276_s15, 0 }
  0x18   : > { %4238 = sst [smem:[#allocation28_spill]] %s3133_s10  ;;  %p2093_p3 = scmp.ge.s32.totalorder %s3149_s14, 1 }
  0x19   : > { %p242_p4 = scmp.lt.s32.totalorder %s3149_s14, 9  ;;  %p3285_p5 = por %p98_p0, %p4213_p1 }
  0x1a   : > { %s3151_s18 = smov [#allocation12]   ;;  %s3152_s21 = smov [#allocation13]  }
  0x1b   : > { %s4239_s16 = scalar_select %p3285_p5, 1, 0 }
  0x1c   : > { %p3289_p6 = pnand %p2093_p3, %p242_p4  ;;  %s254_s19 = sshll.u32 %s3151_s18, 4  ;;  %s255_s19 = int_to_ptr.vmem [resolvable:$true] %s254_s19 }
  0x1d   : > { %4240 = sst [smem:[#allocation29_spill]] %s4239_s16  ;;  %s268_s22 = sshll.u32 %s3152_s21, 4  ;;  %s3301_s22 = int_to_ptr.vmem [resolvable:$true] %s268_s22 }
  0x1e   : > { %s4241_s17 = scalar_select %p3289_p6, 1, 0 }
  0x1f   : > { %p2570_p7 = pneg %p3289_p6  ;;  %s4244_s2 = sld [smem:[#allocation34_spill]] }
  0x20   : > { %4242 = sst [smem:[#allocation30_spill]] %s4241_s17 }
  0x21   : > { %p3297_p8 = pnand %p2570_p7, %p4213_p1 }
  0x23   : > { %p3311_p10 = pneg %p3297_p8 }
  0x25   : > { %s2823_s25 = scalar_lea.hbm %s4244_s2, 2048 }
  0x26   : > { %p2824_p9 = scmp.ne.s32.totalorder %s4244_s2, %s2823_s25  ;;  %p2830_p13 = scmp.lt.u32.totalorder %s2823_s25, %s4244_s2 }
  0x28   : > { %p2826_p11 = pnand %p3311_p10, %p2824_p9 }
  0x2a   : > { %p2827_p12 = pneg %p2826_p11 }
  0x2c   : > { %p2832_p0 = pnand %p2830_p13, %p2827_p12 }
  0x2e   : > { %2835 = shalt.err (!%p2832_p0)
}
  0x2f   : > { %s2836_s23 = scalar_lea.vmem %s255_s19, 2048  ;;  %p2844_p2 = scmp.lt.s32.totalorder %s255_s19, %s255_s19 }
  0x30   : > { %p2837_p3 = scmp.ne.s32.totalorder %s255_s19, %s2836_s23  ;;  %p2845_p1 = scmp.lt.s32.totalorder %s2836_s23, %s2836_s23 }
  0x32   : > { %p2839_p4 = pnand %p2837_p3, %p3311_p10  ;;  %p2846_p5 = por %p2845_p1, %p2844_p2 }
  0x34   : > { %p2840_p7 = pneg %p2839_p4 }
  0x36   : > { %p2847_p6 = pnand %p2846_p5, %p2840_p7 }
  0x38   : > { %2850 = shalt.err (!%p2847_p6)
}
  0x39   : > { %s4219_s7 = smov 128   ;;  %s4221_s24 = smov 8  }
  0x3a   : > { %2573 = dma.hbm_to_vmem [thread:$0]  (!%p3297_p8), %s4244_s2, 2048, %s255_s19, [#allocation11], %s4219_s7, %s4219_s7, %s4221_s24  }
  0x3b   : > { %s4246_s3 = sld [smem:[#allocation35_spill]] }
  0x41   : > { %s2851_s9 = scalar_lea.hbm %s4246_s3, 16 }
  0x42   : > { %p2852_p1 = scmp.ne.s32.totalorder %s4246_s3, %s2851_s9  ;;  %p2858_p6 = scmp.lt.u32.totalorder %s2851_s9, %s4246_s3 }
  0x44   : > { %p2854_p2 = pnand %p2852_p1, %p3311_p10 }
  0x46   : > { %p2855_p5 = pneg %p2854_p2 }
  0x48   : > { %p2860_p9 = pnand %p2858_p6, %p2855_p5 }
  0x4a   : > { %2863 = shalt.err (!%p2860_p9)
}
  0x4b   : > { %s2864_s19 = scalar_lea.vmem %s3301_s22, 16  ;;  %s2871_s6 = scalar_lea.vmem %s3301_s22, 32 }
  0x4c   : > { %p2865_p11 = scmp.ne.s32.totalorder %s3301_s22, %s2864_s19  ;;  %p2872_p0 = scmp.lt.s32.totalorder %s3301_s22, %s3301_s22 }
  0x4d   : > { %p2873_p3 = scmp.lt.s32.totalorder %s2871_s6, %s2864_s19 }
  0x4e   : > { %p2867_p12 = pnand %p2865_p11, %p3311_p10 }
  0x4f   : > { %p2874_p4 = por %p2873_p3, %p2872_p0 }
  0x50   : > { %p2868_p13 = pneg %p2867_p12 }
  0x52   : > { %p2875_p7 = pnand %p2874_p4, %p2868_p13 }
  0x54   : > { %2878 = shalt.err (!%p2875_p7)
}
  0x55   : > { %2576 = dma.hbm_to_vmem [thread:$0]  (!%p3297_p8), %s4246_s3, 16, %s3301_s22, [#allocation14]  }
  0x56   : > { %s3155_s17 = smov [#allocation15]   ;;  %s4247_s4 = sld [smem:[#allocation36_spill]] }
  0x57   : > { %s278_s10 = sshll.u32 %s3155_s17, 4  ;;  %s279_s10 = int_to_ptr.vmem [resolvable:$true] %s278_s10 }
  0x5c   : > { %s2879_s21 = scalar_lea.hbm %s4247_s4, 4096 }
  0x5d   : > { %p2880_p1 = scmp.ne.s32.totalorder %s4247_s4, %s2879_s21  ;;  %p2886_p6 = scmp.lt.u32.totalorder %s2879_s21, %s4247_s4 }
  0x5f   : > { %p2882_p2 = pnand %p2880_p1, %p3311_p10 }
  0x61   : > { %p2883_p5 = pneg %p2882_p2 }
  0x63   : > { %p2888_p9 = pnand %p2886_p6, %p2883_p5 }
  0x65   : > { %2891 = shalt.err (!%p2888_p9)
}
  0x66   : > { %s2892_s22 = scalar_lea.vmem %s279_s10, 4096  ;;  %p2900_p0 = scmp.lt.s32.totalorder %s279_s10, %s279_s10 }
  0x67   : > { %p2893_p11 = scmp.ne.s32.totalorder %s279_s10, %s2892_s22  ;;  %p2901_p3 = scmp.lt.s32.totalorder %s2892_s22, %s2892_s22 }
  0x69   : > { %p2895_p12 = pnand %p2893_p11, %p3311_p10  ;;  %p2902_p4 = por %p2901_p3, %p2900_p0 }
  0x6b   : > { %p2896_p13 = pneg %p2895_p12 }
  0x6d   : > { %p2903_p7 = pnand %p2902_p4, %p2896_p13 }
  0x6f   : > { %2906 = shalt.err (!%p2903_p7)
}
  0x70   : > { %s3156_s9 = smov 256   ;;  %s3157_s16 = smov 16  }
  0x71   : > { %2579 = dma.hbm_to_vmem [thread:$0]  (!%p3297_p8), %s4247_s4, 4096, %s279_s10, [#allocation14], %s3156_s9, %s3156_s9, %s3157_s16  }
  0x72   : > { %s3158_s25 = smov [#allocation16]   ;;  %s4248_s5 = sld [smem:[#allocation37_spill]] }
  0x73   : > { %s292_s26 = sshll.u32 %s3158_s25, 4  ;;  %s293_s26 = int_to_ptr.vmem [resolvable:$true] %s292_s26 }
  0x78   : > { %s2907_s19 = scalar_lea.hbm %s4248_s5, 32 }
  0x79   : > { %p2908_p1 = scmp.ne.s32.totalorder %s4248_s5, %s2907_s19  ;;  %p2914_p6 = scmp.lt.u32.totalorder %s2907_s19, %s4248_s5 }
  0x7b   : > { %p2910_p2 = pnand %p2908_p1, %p3311_p10 }
  0x7d   : > { %p2911_p5 = pneg %p2910_p2 }
  0x7f   : > { %p2916_p9 = pnand %p2914_p6, %p2911_p5 }
  0x81   : > { %2919 = shalt.err (!%p2916_p9)
}
  0x82   : > { %s2920_s10 = scalar_lea.vmem %s293_s26, 32  ;;  %p2928_p0 = scmp.lt.s32.totalorder %s293_s26, %s293_s26 }
  0x83   : > { %p2921_p11 = scmp.ne.s32.totalorder %s293_s26, %s2920_s10  ;;  %p2929_p3 = scmp.lt.s32.totalorder %s2920_s10, %s2920_s10 }
  0x85   : > { %p2923_p12 = pnand %p2921_p11, %p3311_p10  ;;  %p2930_p4 = por %p2929_p3, %p2928_p0 }
  0x87   : > { %p2924_p13 = pneg %p2923_p12 }
  0x89   : > { %p2931_p7 = pnand %p2930_p4, %p2924_p13 }
  0x8b   : > { %2934 = shalt.err (!%p2931_p7)
}
  0x8c   : > { %2582 = dma.hbm_to_vmem [thread:$0]  (!%p3297_p8), %s4248_s5, 32, %s293_s26, [#allocation17]  }
  0x8d   : > { %s2092_s2 = sadd.s32 4294967294, %s3149_s14   ;;  %s41_s20 = sadd.s32 1, %s3137_s11 }
  0x8e   : > { %s44_s18 = sadd.s32 1, %s3141_s12  ;;  %p42_p10 = scmp.ge.s32.totalorder %s41_s20, 2 }
  0x8f   : > { %s48_s24 = sadd.s32 1, %s3145_s13  ;;  %s57_s7 = sadd.s32 1, %s3121_s8 }
  0x90   : > { %p64_p1 = scmp.ne.s32.totalorder %s3121_s8, %s3117_s30  ;;  %s4300_s20 = smov (%p42_p10, %s41_s20), 0 }
  0x91   : > { %4249 = sst [smem:[#allocation31_spill]] %s4300_s20  ;;  %s4302_s18 = smov (!%p42_p10, %s44_s18), %s3141_s12 }
  0x92   : > { %p4228_p2 = scmp.eq.s32.totalorder %s3149_s14, 0  ;;  %p70_p8 = scmp.ne.s32.totalorder %s3117_s30, %s3113_s29 }
  0x93   : > { %p46_p5 = scmp.ge.s32.totalorder %s4302_s18, 2  ;;  %s81_s17 = ssub.s32 %s3137_s11, %s4300_s20 }
  0x94   : > { %p3407_p6 = por %p4228_p2, %p64_p1  ;;  %p4251_p9 = scmp.eq.s32.totalorder %s3276_s15, 0 }
  0x95   : > { %s4304_s18 = smov (%p46_p5, %s4302_s18), 0  ;;  %s4306_s24 = smov (!%p46_p5, %s48_s24), %s3145_s13 }
  0x96   : > { %p3416_p11 = por %p4251_p9, %p70_p8  ;;  %4253 = sst [smem:[#allocation32_spill]] %s4304_s18 }
  0x97   : > { %s53_s21 = ssub.s32 %s3141_s12, %s4304_s18  ;;  %p4254_p12 = scmp.eq.s32.totalorder %s3276_s15, 7 }
  0x98   : > { %p50_p0 = scmp.ge.s32.totalorder %s4306_s24, 2  ;;  %p235_p3 = scmp.eq.s32.totalorder %s2092_s2, 7 }
  0x99   : > { %p3427_p13 = por %p4254_p12, %p64_p1  ;;  %p4227_p4 = scmp.lt.s32.totalorder %s3149_s14, 8 }
  0x9a   : > { %s306_s19 = sand.u32 1, %s3121_s8   ;;  %s4308_s24 = smov (%p50_p0, %s4306_s24), 0 }
  0x9b   : > { %s4255_s23 = scalar_select %p3427_p13, 1, 0 }
  0x9c   : > { %4256 = sst [smem:[#allocation33_spill]] %s4308_s24  ;;  %p3438_p7 = por %p235_p3, %p70_p8 }
  0x9d   : > { %s52_s22 = ssub.s32 %s3145_s13, %s4308_s24  ;;  %s2099_s10 = sshll.u32 %s306_s19, 7 }
  0x9e   : > { %s4257_s6 = scalar_select %p3438_p7, 1, 0 }
  0x9f   : > { %s54_s9 = sor.u32 %s53_s21, %s52_s22  ;;  %s3444_s16 = sor.u32 %s81_s17, %s52_s22 }
  0xa0   : > { %p55_p10 = scmp.eq.s32.totalorder %s54_s9, 0  ;;  %s2100_s2 = sshll.u32 %s3141_s12, 4 }
  0xa1   : > { %s2101_s4 = sshll.u32 %s3145_s13, 5  ;;  %s310_s5 = scalar_lea.vmem [#allocation7], %s2099_s10 }
  0xa2   : > { %s3449_s3 = scalar_select %p55_p10, %s3121_s8, %s57_s7  }
  0xa3   : > { %s319_s18 = sshll.u32 %s310_s5, 4  ;;  %s316_s20 = sadd.s32 %s2101_s4, %s2100_s2  ;;  %s3452_s18 = int_to_ptr.vmem [resolvable:$true] %s319_s18 }
  0xa4   : > { %s2102_s29 = sshll.u32 %s316_s20, 7  ;;  %p3458_p8 = pnand %p4227_p4, %p3407_p6 }
  0xa5   : > { %s3465_s7 = scalar_lea.hbm %s4204_s0, %s2102_s29  ;;  %s2104_s5 = sshll.u32 %s3137_s11, 4 }
  0xa6   : > { %s3468_s22 = sadd.s32 %s2104_s5, %s2101_s4  ;;  %s3470_s20 = scalar_lea.sflag [#allocation8], %s306_s19 }
  0xa7   : > { %s2935_s25 = scalar_lea.hbm %s3465_s7, 2048  ;;  %p2937_p6 = pneg %p3458_p8 }
  0xa8   : > { %p2936_p5 = scmp.ne.s32.totalorder %s3465_s7, %s2935_s25  ;;  %s2940_s9 = scalar_lea.hbm %s4204_s0, 8192 }
  0xa9   : > { %p2941_p0 = scmp.lt.u32.totalorder %s3465_s7, %s4204_s0  ;;  %p2942_p3 = scmp.lt.u32.totalorder %s2940_s9, %s2935_s25 }
  0xaa   : > { %p2938_p9 = pnand %p2937_p6, %p2936_p5  ;;  %p2944_p4 = scmp.lt.u32.totalorder %s2935_s25, %s3465_s7 }
  0xab   : > { %p2943_p10 = por %p2942_p3, %p2941_p0 }
  0xac   : > { %p2939_p12 = pneg %p2938_p9 }
  0xad   : > { %p2945_p2 = por %p2944_p4, %p2943_p10 }
  0xaf   : > { %p2946_p1 = pnand %p2945_p2, %p2939_p12 }
  0xb1   : > { %2949 = shalt.err (!%p2946_p1)
}
  0xb2   : > { %s2950_s4 = scalar_lea.vmem %s3452_s18, 2048  ;;  %s3159_s19 = smov [#allocation7]  }
  0xb3   : > { %p2951_p5 = scmp.ne.s32.totalorder %s3452_s18, %s2950_s4  ;;  %s2955_s21 = sshll.u32 %s3159_s19, 4  ;;  %s2956_s21 = int_to_ptr.vmem [resolvable:$false] %s2955_s21 }
  0xb4   : > { %s2957_s5 = scalar_lea.vmem %s2956_s21, 4096  ;;  %p2958_p13 = scmp.lt.s32.totalorder %s3452_s18, %s2956_s21 }
  0xb5   : > { %p2953_p9 = pnand %p2951_p5, %p2937_p6  ;;  %p2959_p0 = scmp.lt.s32.totalorder %s2957_s5, %s2950_s4 }
  0xb7   : > { %p2954_p7 = pneg %p2953_p9  ;;  %p2960_p3 = por %p2959_p0, %p2958_p13 }
  0xb9   : > { %p2961_p4 = pnand %p2960_p3, %p2954_p7 }
  0xbb   : > { %2964 = shalt.err (!%p2961_p4)
}
  0xbc   : > { %s4259_s25 = smov 8   ;;  %s4260_s10 = smov 128  }
  0xbd   : > { %2586 = dma.hbm_to_vmem [thread:$0]  (!%p3458_p8), %s3465_s7, 2048, %s3452_s18, %s3470_s20, %s4260_s10, %s4260_s10, %s4259_s25  }
  0xbe   : > { %s2106_s29 = sshll.u32 %s3468_s22, 7  ;;  %s85_s9 = sadd.s32 1, %s3109_s28 }
  0xbf   : > { %p92_p2 = scmp.ne.s32.totalorder %s3109_s28, %s3105_s27  ;;  %p4261_p13 = scmp.eq.s32.totalorder %s3444_s16, 0 }
  0xc0   : > { %p4262_p7 = scmp.eq.s32.totalorder %s3149_s14, 0  ;;  %s329_s2 = sand.u32 1, %s3149_s14  }
  0xc1   : > { %s3508_s24 = scalar_select %p4261_p13, %s3109_s28, %s85_s9  }
  0xc2   : > { %p94_p1 = por %p92_p2, %p4262_p7  ;;  %s3516_s19 = scalar_lea.hbm %s4205_s1, %s2106_s29 }
  0xc3   : > { %s331_s21 = sand.u32 1, %s3109_s28   ;;  %p4263_p8 = scmp.lt.s32.totalorder %s3149_s14, 8 }
  0xc4   : > { %s2103_s18 = sshll.u32 %s331_s21, 7  ;;  %s3527_s20 = scalar_lea.sflag [#allocation11], %s329_s2 }
  0xc5   : > { %p3521_p6 = pnand %p4263_p8, %p94_p1  ;;  %s333_s16 = scalar_lea.vmem [#allocation10], %s2103_s18 }
  0xc6   : > { %s342_s22 = sshll.u32 %s333_s16, 4  ;;  %s2965_s5 = scalar_lea.hbm %s3516_s19, 2048  ;;  %s3525_s22 = int_to_ptr.vmem [resolvable:$true] %s342_s22 }
  0xc7   : > { %p2966_p12 = scmp.ne.s32.totalorder %s3516_s19, %s2965_s5  ;;  %p2967_p10 = pneg %p3521_p6 }
  0xc8   : > { %s2970_s17 = scalar_lea.hbm %s4205_s1, 8192  ;;  %p2971_p0 = scmp.lt.u32.totalorder %s3516_s19, %s4205_s1 }
  0xc9   : > { %p2968_p5 = pnand %p2967_p10, %p2966_p12  ;;  %p2972_p3 = scmp.lt.u32.totalorder %s2970_s17, %s2965_s5 }
  0xca   : > { %p2974_p2 = scmp.lt.u32.totalorder %s2965_s5, %s3516_s19 }
  0xcb   : > { %p2969_p9 = pneg %p2968_p5  ;;  %p2973_p4 = por %p2972_p3, %p2971_p0 }
  0xcd   : > { %p2975_p13 = por %p2974_p2, %p2973_p4 }
  0xcf   : > { %p2976_p7 = pnand %p2975_p13, %p2969_p9 }
  0xd1   : > { %2979 = shalt.err (!%p2976_p7)
}
  0xd2   : > { %s2980_s2 = scalar_lea.vmem %s3525_s22, 2048  ;;  %s3160_s18 = smov [#allocation10]  }
  0xd3   : > { %p2981_p1 = scmp.ne.s32.totalorder %s3525_s22, %s2980_s2  ;;  %s2985_s16 = sshll.u32 %s3160_s18, 4  ;;  %s2986_s16 = int_to_ptr.vmem [resolvable:$false] %s2985_s16 }
  0xd4   : > { %s2987_s29 = scalar_lea.vmem %s2986_s16, 4096  ;;  %p2988_p5 = scmp.lt.s32.totalorder %s3525_s22, %s2986_s16 }
  0xd5   : > { %p2983_p8 = pnand %p2981_p1, %p2967_p10  ;;  %p2989_p0 = scmp.lt.s32.totalorder %s2987_s29, %s2980_s2 }
  0xd7   : > { %p2984_p12 = pneg %p2983_p8  ;;  %p2990_p3 = por %p2989_p0, %p2988_p5 }
  0xd9   : > { %p2991_p4 = pnand %p2990_p3, %p2984_p12 }
  0xdb   : > { %2994 = shalt.err (!%p2991_p4)
}
  0xdc   : > { %2589 = dma.hbm_to_vmem [thread:$0]  (!%p3521_p6), %s3516_s19, 2048, %s3525_s22, %s3527_s20, %s4260_s10, %s4260_s10, %s4259_s25  }
  0xdd   : > { %s4265_s5 = sld [smem:[#allocation30_spill]] }
  0xe3   : > { %p4266_p10 = scmp.ne.s32.totalorder %s4265_s5, 0 }
  0xe4   : > { %s3561_s9 = sand.u32 (!%p4266_p10), 1, %s3117_s30  }
  0xe5   : > { %354 = sbr.rel (%p4266_p10) target bundleno = 1773 (0x6ed), region = 48  ;;  %s2108_s17 = sshll.u32 (!%p4266_p10), %s3561_s9, 7 }
  0xe6   : > { %s357_s4 = scalar_lea.sflag (!%p4266_p10), [#allocation8], %s3561_s9  ;;  %s3565_s21 = scalar_lea.vmem (!%p4266_p10), [#allocation7], %s2108_s17 }
  0xec   : > { %3076 = dma.done.wait (%p3416_p11), %s357_s4, 2048  }
  0xed   : > { %3078 = vsyncadd (%p3416_p11), %s357_s4, 4294965248  ;;  %s4267_s25 = sld [smem:[#allocation29_spill]]  ;;  %s365_s10 = sand.u32 1, %s3276_s15  }
  0xee   : > { %s367_s19 = sand.u32 1, %s3105_s27   ;;  %s366_s22 = scalar_lea.sflag [#allocation11], %s365_s10 }
  0xef   : > { %s2109_s7 = sshll.u32 %s367_s19, 7 }
  0xf0   : > { %s3573_s20 = scalar_lea.vmem [#allocation10], %s2109_s7 }
  0xf3   : > { %p4268_p6 = scmp.ne.s32.totalorder %s4267_s25, 0 }
  0xf5   : > { %3080 = dma.done.wait (%p4268_p6), %s366_s22, 2048  }
  0xf6   : > { %3082 = vsyncadd (%p4268_p6), %s366_s22, 4294965248  ;;  %p4269_p9 = scmp.eq.s32.totalorder %s3276_s15, 0 }
  0xf8   : > { %3084 = dma.done.wait (%p4269_p9), [#allocation11], 2048   ;;  %p4270_p2 = pmov %p4269_p9 }
  0xfa   : > { %3086 = vsyncadd (%p4270_p2), [#allocation11], 4294965248  ;;  %p4271_p11 = pmov %p4270_p2 }
  0xfb   : > { %p4272_p13 = pmov %p4270_p2 }
  0xfc   : > { %3088 = dma.done.wait (%p4271_p11), [#allocation14], 4112  }
  0xfd   : > { %3090 = vsyncadd (%p4272_p13), [#allocation14], 4294963184  ;;  %p4273_p7 = pmov %p4270_p2 }
  0xfe   : > { %p4274_p1 = pmov %p4270_p2 }
  0xff   : > { %3092 = dma.done.wait (%p4273_p7), [#allocation17], 32  }
 0x100   : > { %3094 = vsyncadd (%p4274_p1), [#allocation17], 4294967264  ;;  %s3591_s26 = scalar_lea.vmem [#allocation18], %s2108_s17  ;;  %s4275_s2 = sld [smem:[#allocation26_spill]] }
 0x106   : > { %p2115_p8 = scmp.ne.s32.totalorder %s4275_s2, 0 }
 0x107   : > { %v444_v0 = vld [vmem:[#allocation12] sm:$0xff] (!%p2115_p8)  ;;  %v445_v1 = vld [vmem:[#allocation12 + $0x8] sm:$0xff] (!%p2115_p8)  ;;  %v446_v2 = vld [vmem:[#allocation12 + $0x10] sm:$0xff] (!%p2115_p8)  ;;  %vm628_vm0 = vcmask (!%p2115_p8), 7168   ;;  %v3161_v40 = vmov (!%p2115_p8), -1e+30  }
 0x108   : > { %427 = sbr.rel (%p2115_p8) target bundleno = 526 (0x20e), region = 76  ;;  %v2388_v3 = vpack.c.bf16 (!%p2115_p8), %v445_v1, %v444_v0  ;;  %v447_v4 = vld [vmem:[#allocation12 + $0x18] sm:$0xff] (!%p2115_p8)  ;;  %v448_v6 = vld [vmem:[#allocation12 + $0x20] sm:$0xff] (!%p2115_p8)  ;;  %v449_v7 = vld [vmem:[#allocation12 + $0x28] sm:$0xff] (!%p2115_p8)  ;;  %629 = vst.msk [vmem:[#allocation3] sm:$0xff] (!%p2115_p8), %vm628_vm0, %v3161_v40  ;;  %v3162_v41 = vmov (!%p2115_p8), 0.0  }
 0x109   : > { %v2392_v5 = vpack.c.bf16 (!%p2115_p8), %v447_v4, %v446_v2  ;;  %v2396_v8 = vpack.c.bf16 (!%p2115_p8), %v449_v7, %v448_v6  ;;  %v428_v9 = vld [vmem:[%s3565_s21] sm:$0xff] (!%p2115_p8)  ;;  %v450_v11 = vld [vmem:[#allocation12 + $0x30] sm:$0xff] (!%p2115_p8)  ;;  %v451_v12 = vld [vmem:[#allocation12 + $0x38] sm:$0xff] (!%p2115_p8)  ;;  %630 = vst.msk [vmem:[#allocation3 + $0x8] sm:$0xff] (!%p2115_p8), %vm628_vm0, %v3161_v40 }
 0x10a   : > { %2389 = vmatprep.subr.bf16.mxu0 (!%p2115_p8), %v2388_v3  ;;  %2516 = vmatprep.subr.bf16.mxu1 (!%p2115_p8), %v2388_v3  ;;  %v436_v10 = vld [vmem:[%s3565_s21 + $0x40] sm:$0xff] (!%p2115_p8)  ;;  %v2400_v13 = vpack.c.bf16 (!%p2115_p8), %v451_v12, %v450_v11  ;;  %v453_v15 = vld [vmem:[#allocation12 + $0x48] sm:$0xff] (!%p2115_p8)  ;;  %v454_v17 = vld [vmem:[#allocation12 + $0x50] sm:$0xff] (!%p2115_p8)  ;;  %631 = vst.msk [vmem:[#allocation3 + $0x10] sm:$0xff] (!%p2115_p8), %vm628_vm0, %v3161_v40 }
 0x10b   : > { %2391 = vmatpush3.bf16.msra.mxu0 (!%p2115_p8), %v2388_v3  ;;  %2524 = vmatpush3.bf16.msra.mxu1 (!%p2115_p8), %v2388_v3  ;;  %v452_v14 = vld [vmem:[#allocation12 + $0x40] sm:$0xff] (!%p2115_p8)  ;;  %v455_v18 = vld [vmem:[#allocation12 + $0x58] sm:$0xff] (!%p2115_p8)  ;;  %v457_v21 = vld [vmem:[#allocation12 + $0x68] sm:$0xff] (!%p2115_p8)  ;;  %632 = vst.msk [vmem:[#allocation3 + $0x18] sm:$0xff] (!%p2115_p8), %vm628_vm0, %v3161_v40 }
 0x10c   : > { %2393 = vmatprep.subr.bf16.mxu0 (!%p2115_p8), %v2392_v5  ;;  %2517 = vmatprep.subr.bf16.mxu1 (!%p2115_p8), %v2392_v5  ;;  %v2404_v16 = vpack.c.bf16 (!%p2115_p8), %v453_v15, %v452_v14  ;;  %v2408_v19 = vpack.c.bf16 (!%p2115_p8), %v455_v18, %v454_v17  ;;  %v456_v20 = vld [vmem:[#allocation12 + $0x60] sm:$0xff] (!%p2115_p8)  ;;  %v458_v23 = vld [vmem:[#allocation12 + $0x70] sm:$0xff] (!%p2115_p8)  ;;  %v459_v24 = vld [vmem:[#allocation12 + $0x78] sm:$0xff] (!%p2115_p8)  ;;  %633 = vst.msk [vmem:[#allocation3 + $0x20] sm:$0xff] (!%p2115_p8), %vm628_vm0, %v3161_v40 }
 0x10d   : > { %2252 = vmatprep.mubr.f32.mxu0 (!%p2115_p8), %v428_v9  ;;  %2264 = vmatprep.mubr.f32.mxu1 (!%p2115_p8), %v436_v10  ;;  %v2412_v22 = vpack.c.bf16 (!%p2115_p8), %v457_v21, %v456_v20  ;;  %v2416_v25 = vpack.c.bf16 (!%p2115_p8), %v459_v24, %v458_v23  ;;  %v429_v26 = vld [vmem:[%s3565_s21 + $0x8] sm:$0xff] (!%p2115_p8)  ;;  %v430_v28 = vld [vmem:[%s3565_s21 + $0x10] sm:$0xff] (!%p2115_p8)  ;;  %v431_v30 = vld [vmem:[%s3565_s21 + $0x18] sm:$0xff] (!%p2115_p8)  ;;  %634 = vst.msk [vmem:[#allocation3 + $0x28] sm:$0xff] (!%p2115_p8), %vm628_vm0, %v3161_v40 }
 0x10e   : > { %v437_v27 = vld [vmem:[%s3565_s21 + $0x48] sm:$0xff] (!%p2115_p8)  ;;  %v438_v29 = vld [vmem:[%s3565_s21 + $0x50] sm:$0xff] (!%p2115_p8)  ;;  %v439_v31 = vld [vmem:[%s3565_s21 + $0x58] sm:$0xff] (!%p2115_p8)  ;;  %635 = vst.msk [vmem:[#allocation3 + $0x30] sm:$0xff] (!%p2115_p8), %vm628_vm0, %v3161_v40 }
 0x10f   : > { %2395 = vmatpush3.bf16.msra.mxu0 %v2392_v5  ;;  %2525 = vmatpush3.bf16.msra.mxu1 %v2392_v5  ;;  %v432_v32 = vld [vmem:[%s3565_s21 + $0x20] sm:$0xff]  ;;  %v433_v34 = vld [vmem:[%s3565_s21 + $0x28] sm:$0xff]  ;;  %v434_v36 = vld [vmem:[%s3565_s21 + $0x30] sm:$0xff]  ;;  %636 = vst.msk [vmem:[#allocation3 + $0x38] sm:$0xff] %vm628_vm0, %v3161_v40 }
 0x110   : > { %2397 = vmatprep.subr.bf16.mxu0 %v2396_v8  ;;  %2518 = vmatprep.subr.bf16.mxu1 %v2396_v8  ;;  %v440_v33 = vld [vmem:[%s3565_s21 + $0x60] sm:$0xff]  ;;  %v441_v35 = vld [vmem:[%s3565_s21 + $0x68] sm:$0xff]  ;;  %v442_v37 = vld [vmem:[%s3565_s21 + $0x70] sm:$0xff]  ;;  %637 = vst.msk [vmem:[#allocation3 + $0x40] sm:$0xff] %vm628_vm0, %v3161_v40 }
 0x111   : > { %v435_v38 = vld [vmem:[%s3565_s21 + $0x38] sm:$0xff]  ;;  %638 = vst.msk [vmem:[#allocation3 + $0x48] sm:$0xff] %vm628_vm0, %v3161_v40  ;;  %639 = vst.msk [vmem:[#allocation3 + $0x50] sm:$0xff] %vm628_vm0, %v3161_v40  ;;  %v2116_v42 = vld [vmem:[#allocation13] ss:$0 sm:$0xff] }
 0x112   : > { %v443_v39 = vld [vmem:[%s3565_s21 + $0x78] sm:$0xff]  ;;  %640 = vst.msk [vmem:[#allocation3 + $0x58] sm:$0xff] %vm628_vm0, %v3161_v40  ;;  %641 = vst.msk [vmem:[#allocation3 + $0x60] sm:$0xff] %vm628_vm0, %v3161_v40 }
 0x113   : > { %2399 = vmatpush3.bf16.msra.mxu0 %v2396_v8  ;;  %2526 = vmatpush3.bf16.msra.mxu1 %v2396_v8  ;;  %642 = vst.msk [vmem:[#allocation3 + $0x68] sm:$0xff] %vm628_vm0, %v3161_v40  ;;  %643 = vst.msk [vmem:[#allocation3 + $0x70] sm:$0xff] %vm628_vm0, %v3161_v40 }
 0x114   : > { %2401 = vmatprep.subr.bf16.mxu0 %v2400_v13  ;;  %2519 = vmatprep.subr.bf16.mxu1 %v2400_v13  ;;  %644 = vst.msk [vmem:[#allocation3 + $0x78] sm:$0xff] %vm628_vm0, %v3161_v40  ;;  %645 = vst.msk [vmem:[#allocation4] sm:$0xff] %vm628_vm0, %v3162_v41 }
 0x115   : > { %646 = vst.msk [vmem:[#allocation4 + $0x8] sm:$0xff] %vm628_vm0, %v3162_v41  ;;  %647 = vst.msk [vmem:[#allocation4 + $0x10] sm:$0xff] %vm628_vm0, %v3162_v41 }
 0x116   : > { %648 = vst.msk [vmem:[#allocation4 + $0x18] sm:$0xff] %vm628_vm0, %v3162_v41  ;;  %649 = vst.msk [vmem:[#allocation4 + $0x20] sm:$0xff] %vm628_vm0, %v3162_v41 }
 0x117   : > { %2403 = vmatpush3.bf16.msra.mxu0 %v2400_v13  ;;  %2527 = vmatpush3.bf16.msra.mxu1 %v2400_v13  ;;  %650 = vst.msk [vmem:[#allocation4 + $0x28] sm:$0xff] %vm628_vm0, %v3162_v41  ;;  %651 = vst.msk [vmem:[#allocation4 + $0x30] sm:$0xff] %vm628_vm0, %v3162_v41 }
 0x118   : > { %2405 = vmatprep.subr.bf16.mxu0 %v2404_v16  ;;  %2520 = vmatprep.subr.bf16.mxu1 %v2404_v16  ;;  %652 = vst.msk [vmem:[#allocation4 + $0x38] sm:$0xff] %vm628_vm0, %v3162_v41  ;;  %653 = vst.msk [vmem:[#allocation4 + $0x40] sm:$0xff] %vm628_vm0, %v3162_v41 }
 0x119   : > { %654 = vst.msk [vmem:[#allocation4 + $0x48] sm:$0xff] %vm628_vm0, %v3162_v41  ;;  %655 = vst.msk [vmem:[#allocation4 + $0x50] sm:$0xff] %vm628_vm0, %v3162_v41 }
 0x11a   : > { %656 = vst.msk [vmem:[#allocation4 + $0x58] sm:$0xff] %vm628_vm0, %v3162_v41  ;;  %657 = vst.msk [vmem:[#allocation4 + $0x60] sm:$0xff] %vm628_vm0, %v3162_v41 }
 0x11b   : > { %2407 = vmatpush3.bf16.msra.mxu0 %v2404_v16  ;;  %2528 = vmatpush3.bf16.msra.mxu1 %v2404_v16  ;;  %658 = vst.msk [vmem:[#allocation4 + $0x68] sm:$0xff] %vm628_vm0, %v3162_v41  ;;  %659 = vst.msk [vmem:[#allocation4 + $0x70] sm:$0xff] %vm628_vm0, %v3162_v41 }
 0x11c   : > { %2409 = vmatprep.subr.bf16.mxu0 %v2408_v19  ;;  %2521 = vmatprep.subr.bf16.mxu1 %v2408_v19  ;;  %660 = vst.msk [vmem:[#allocation4 + $0x78] sm:$0xff] %vm628_vm0, %v3162_v41  ;;  %661 = vst [vmem:[#allocation5] sm:$0xff] %v3162_v41 }
 0x11d   : > { %662 = vst [vmem:[#allocation5 + $0x8] sm:$0xff] %v3162_v41  ;;  %663 = vst [vmem:[#allocation5 + $0x10] sm:$0xff] %v3162_v41 }
 0x11e   : > { %664 = vst [vmem:[#allocation5 + $0x18] sm:$0xff] %v3162_v41  ;;  %665 = vst [vmem:[#allocation5 + $0x20] sm:$0xff] %v3162_v41 }
 0x11f   : > { %2411 = vmatpush3.bf16.msra.mxu0 %v2408_v19  ;;  %2529 = vmatpush3.bf16.msra.mxu1 %v2408_v19  ;;  %666 = vst [vmem:[#allocation5 + $0x28] sm:$0xff] %v3162_v41  ;;  %667 = vst [vmem:[#allocation5 + $0x30] sm:$0xff] %v3162_v41 }
 0x120   : > { %2413 = vmatprep.subr.bf16.mxu0 %v2412_v22  ;;  %2522 = vmatprep.subr.bf16.mxu1 %v2412_v22  ;;  %668 = vst [vmem:[#allocation5 + $0x38] sm:$0xff] %v3162_v41  ;;  %669 = vst [vmem:[#allocation5 + $0x40] sm:$0xff] %v3162_v41 }
 0x121   : > { %670 = vst [vmem:[#allocation5 + $0x48] sm:$0xff] %v3162_v41  ;;  %671 = vst [vmem:[#allocation5 + $0x50] sm:$0xff] %v3162_v41 }
 0x122   : > { %672 = vst [vmem:[#allocation5 + $0x58] sm:$0xff] %v3162_v41  ;;  %673 = vst [vmem:[#allocation5 + $0x60] sm:$0xff] %v3162_v41 }
 0x123   : > { %2415 = vmatpush3.bf16.msra.mxu0 %v2412_v22  ;;  %2530 = vmatpush3.bf16.msra.mxu1 %v2412_v22  ;;  %674 = vst [vmem:[#allocation5 + $0x68] sm:$0xff] %v3162_v41  ;;  %675 = vst [vmem:[#allocation5 + $0x70] sm:$0xff] %v3162_v41 }
 0x124   : > { %2417 = vmatprep.subr.bf16.mxu0 %v2416_v25  ;;  %2523 = vmatprep.subr.bf16.mxu1 %v2416_v25  ;;  %676 = vst [vmem:[#allocation5 + $0x78] sm:$0xff] %v3162_v41 }
 0x127   : > { %2419 = vmatpush3.bf16.msra.mxu0 %v2416_v25  ;;  %2531 = vmatpush3.bf16.msra.mxu1 %v2416_v25 }
 0x12a   : > { %2253 = vmatmul.mubr.f32.vlgmr.msra.gmra.mrb[0].mxu0 %v429_v26  ;;  %2265 = vmatmul.mubr.f32.vlgmr.msra.gmra.mrb[0].mxu1 %v437_v27 }
 0x12b   : > { %2255 = vmatprep.mubr.f32.mxu0 %v430_v28  ;;  %2267 = vmatprep.mubr.f32.mxu1 %v438_v29 }
 0x12e   : > { %2256 = vmatmul.mubr.f32.gmra.mrb[2].mxu0 %v431_v30  ;;  %2268 = vmatmul.mubr.f32.gmra.mrb[2].mxu1 %v439_v31 }
 0x12f   : > { %2258 = vmatprep.mubr.f32.mxu0 %v432_v32  ;;  %2270 = vmatprep.mubr.f32.mxu1 %v440_v33 }
 0x132   : > { %2259 = vmatmul.mubr.f32.gmra.mrb[4].mxu0 %v433_v34  ;;  %2271 = vmatmul.mubr.f32.gmra.mrb[4].mxu1 %v441_v35 }
 0x133   : > { %2261 = vmatprep.mubr.f32.mxu0 %v434_v36  ;;  %2273 = vmatprep.mubr.f32.mxu1 %v442_v37 }
 0x136   : > { %2262 = vmatmul.mubr.f32.gmra.mrb[6].mxu0 %v435_v38  ;;  %2274 = vmatmul.mubr.f32.gmra.mrb[6].mxu1 %v443_v39 }
 0x1fd   : > { %v2254_v43 = vpop.f32.mrb[0].mxu0  ;;  %v2266_v44 = vpop.f32.mrb[0].mxu1 }
 0x1fe   : > { %v539_v45 = vadd.f32 %v2254_v43, %v2116_v42  ;;  %v579_v46 = vadd.f32 %v2266_v44, %v2116_v42  ;;  %v533_v47 = vpop.f32.mrb[1].mxu0  ;;  %v573_v48 = vpop.f32.mrb[1].mxu1 }
 0x1ff   : > { %v534_v49 = vadd.f32 %v2116_v42, %v533_v47  ;;  %v574_v50 = vadd.f32 %v2116_v42, %v573_v48 }
 0x200   : > { %613 = vst [vmem:[#allocation2 + $0x8] sm:$0xff] %v539_v45  ;;  %621 = vst [vmem:[#allocation2 + $0x48] sm:$0xff] %v579_v46 }
 0x201   : > { %612 = vst [vmem:[#allocation2] sm:$0xff] %v534_v49  ;;  %620 = vst [vmem:[#allocation2 + $0x40] sm:$0xff] %v574_v50  ;;  %v2257_v51 = vpop.f32.mrb[2].mxu0  ;;  %v2269_v52 = vpop.f32.mrb[2].mxu1 }
 0x202   : > { %v549_v53 = vadd.f32 %v2257_v51, %v2116_v42  ;;  %v589_v54 = vadd.f32 %v2269_v52, %v2116_v42  ;;  %v543_v55 = vpop.f32.mrb[3].mxu0  ;;  %v583_v56 = vpop.f32.mrb[3].mxu1 }
 0x203   : > { %v544_v57 = vadd.f32 %v2116_v42, %v543_v55  ;;  %v584_v58 = vadd.f32 %v2116_v42, %v583_v56 }
 0x204   : > { %615 = vst [vmem:[#allocation2 + $0x18] sm:$0xff] %v549_v53  ;;  %623 = vst [vmem:[#allocation2 + $0x58] sm:$0xff] %v589_v54 }
 0x205   : > { %614 = vst [vmem:[#allocation2 + $0x10] sm:$0xff] %v544_v57  ;;  %622 = vst [vmem:[#allocation2 + $0x50] sm:$0xff] %v584_v58  ;;  %v2260_v59 = vpop.f32.mrb[4].mxu0  ;;  %v2272_v60 = vpop.f32.mrb[4].mxu1 }
 0x206   : > { %v559_v61 = vadd.f32 %v2260_v59, %v2116_v42  ;;  %v599_v62 = vadd.f32 %v2272_v60, %v2116_v42  ;;  %v553_v63 = vpop.f32.mrb[5].mxu0  ;;  %v593_v0 = vpop.f32.mrb[5].mxu1 }
 0x207   : > { %v554_v1 = vadd.f32 %v2116_v42, %v553_v63  ;;  %v594_v2 = vadd.f32 %v2116_v42, %v593_v0 }
 0x208   : > { %617 = vst [vmem:[#allocation2 + $0x28] sm:$0xff] %v559_v61  ;;  %625 = vst [vmem:[#allocation2 + $0x68] sm:$0xff] %v599_v62 }
 0x209   : > { %616 = vst [vmem:[#allocation2 + $0x20] sm:$0xff] %v554_v1  ;;  %624 = vst [vmem:[#allocation2 + $0x60] sm:$0xff] %v594_v2  ;;  %v2263_v3 = vpop.f32.mrb[6].mxu0  ;;  %v2275_v4 = vpop.f32.mrb[6].mxu1 }
 0x20a   : > { %v569_v5 = vadd.f32 %v2263_v3, %v2116_v42  ;;  %v609_v6 = vadd.f32 %v2275_v4, %v2116_v42  ;;  %v563_v7 = vpop.f32.mrb[7].mxu0  ;;  %v603_v8 = vpop.f32.mrb[7].mxu1 }
 0x20b   : > { %v564_v9 = vadd.f32 %v2116_v42, %v563_v7  ;;  %v604_v10 = vadd.f32 %v2116_v42, %v603_v8 }
 0x20c   : > { %619 = vst [vmem:[#allocation2 + $0x38] sm:$0xff] %v569_v5  ;;  %627 = vst [vmem:[#allocation2 + $0x78] sm:$0xff] %v609_v6 }
 0x20d   : > { %618 = vst [vmem:[#allocation2 + $0x30] sm:$0xff] %v564_v9  ;;  %626 = vst [vmem:[#allocation2 + $0x70] sm:$0xff] %v604_v10 }
 0x20e PF: > { %v694_v11 = vld [vmem:[#allocation15 + $0x8] sm:$0xff]  ;;  %v696_v12 = vld [vmem:[#allocation15 + $0x18] sm:$0xff]  ;;  %v693_v13 = vld [vmem:[#allocation15] sm:$0xff]  ;;  %v3163_v18 = vmov 0.0   ;;  %vm1379_vm1 = vcmask 7168   ;;  %s4276_s15 = sld [smem:[#allocation26_spill]] }
 0x20f   : > { %v2420_v14 = vpack.c.bf16 %v696_v12, %v694_v11  ;;  %v695_v15 = vld [vmem:[#allocation15 + $0x10] sm:$0xff]  ;;  %v698_v16 = vld [vmem:[#allocation15 + $0x28] sm:$0xff]  ;;  %v700_v17 = vld [vmem:[#allocation15 + $0x38] sm:$0xff]  ;;  %801 = vmatprep.mubr.f32.mxu0 %v3163_v18 }
 0x210   : > { %v2422_v19 = vpack.c.bf16 %v695_v15, %v693_v13  ;;  %v2424_v20 = vpack.c.bf16 %v700_v17, %v698_v16  ;;  %v697_v21 = vld [vmem:[#allocation15 + $0x20] sm:$0xff]  ;;  %v699_v22 = vld [vmem:[#allocation15 + $0x30] sm:$0xff]  ;;  %v702_v23 = vld [vmem:[#allocation15 + $0x48] sm:$0xff]  ;;  %v727_v13 = vlaneseq }
 0x211   : > { %2421 = vmatprep.subr.bf16.mxu0 %v2420_v14  ;;  %v704_v24 = vld [vmem:[#allocation15 + $0x58] sm:$0xff]  ;;  %v2426_v25 = vpack.c.bf16 %v699_v22, %v697_v21  ;;  %v701_v27 = vld [vmem:[#allocation15 + $0x40] sm:$0xff]  ;;  %v703_v28 = vld [vmem:[#allocation15 + $0x50] sm:$0xff] }
 0x212   : > { %2423 = vmatpush1.bf16.msra.mxu0 %v2422_v19  ;;  %v2428_v26 = vpack.c.bf16 %v704_v24, %v702_v23  ;;  %v706_v29 = vld [vmem:[#allocation15 + $0x68] sm:$0xff]  ;;  %v708_v30 = vld [vmem:[#allocation15 + $0x78] sm:$0xff]  ;;  %v2430_v31 = vpack.c.bf16 %v703_v28, %v701_v27  ;;  %v705_v33 = vld [vmem:[#allocation15 + $0x60] sm:$0xff]  ;;  %v728_v14 = vshrl.u32 %v727_v13, 7 }
 0x213   : > { %2425 = vmatprep.subr.bf16.mxu0 %v2424_v20  ;;  %v2432_v32 = vpack.c.bf16 %v708_v30, %v706_v29  ;;  %v707_v34 = vld [vmem:[#allocation15 + $0x70] sm:$0xff]  ;;  %v710_v35 = vld [vmem:[#allocation15 + $0x88] sm:$0xff]  ;;  %v712_v36 = vld [vmem:[#allocation15 + $0x98] sm:$0xff] }
 0x214   : > { %v2434_v37 = vpack.c.bf16 %v707_v34, %v705_v33  ;;  %v2436_v38 = vpack.c.bf16 %v712_v36, %v710_v35  ;;  %v709_v39 = vld [vmem:[#allocation15 + $0x80] sm:$0xff]  ;;  %v711_v40 = vld [vmem:[#allocation15 + $0x90] sm:$0xff]  ;;  %v714_v41 = vld [vmem:[#allocation15 + $0xa8] sm:$0xff]  ;;  %v729_v15 = vsub.s32 0, %v728_v14  ;;  %v733_v17 = vsub.s32 1, %v728_v14  ;;  %p2117_p12 = scmp.ne.s32.totalorder %s4276_s15, 1 }
 0x215   : > { %v716_v42 = vld [vmem:[#allocation15 + $0xb8] sm:$0xff]  ;;  %v2438_v43 = vpack.c.bf16 %v711_v40, %v709_v39  ;;  %v713_v45 = vld [vmem:[#allocation15 + $0xa0] sm:$0xff]  ;;  %v715_v46 = vld [vmem:[#allocation15 + $0xb0] sm:$0xff]  ;;  %s1737_s18 = sld [smem:[#allocation6]] (!%p2117_p12) }
 0x216   : > { %2427 = vmatpush1.bf16.msra.mxu0 %v2426_v25  ;;  %v2440_v44 = vpack.c.bf16 %v716_v42, %v714_v41  ;;  %v718_v47 = vld [vmem:[#allocation15 + $0xc8] sm:$0xff]  ;;  %v720_v48 = vld [vmem:[#allocation15 + $0xd8] sm:$0xff]  ;;  %v2442_v49 = vpack.c.bf16 %v715_v46, %v713_v45  ;;  %v717_v51 = vld [vmem:[#allocation15 + $0xc0] sm:$0xff] }
 0x217   : > { %2429 = vmatprep.subr.bf16.mxu0 %v2428_v26  ;;  %v2444_v50 = vpack.c.bf16 %v720_v48, %v718_v47  ;;  %v719_v52 = vld [vmem:[#allocation15 + $0xd0] sm:$0xff]  ;;  %v722_v53 = vld [vmem:[#allocation15 + $0xe8] sm:$0xff]  ;;  %v724_v54 = vld [vmem:[#allocation15 + $0xf8] sm:$0xff] }
 0x218   : > { %v2446_v55 = vpack.c.bf16 %v719_v52, %v717_v51  ;;  %v2448_v56 = vpack.c.bf16 %v724_v54, %v722_v53  ;;  %v721_v57 = vld [vmem:[#allocation15 + $0xe0] sm:$0xff]  ;;  %v723_v58 = vld [vmem:[#allocation15 + $0xf0] sm:$0xff] }
 0x219   : > { %v2450_v59 = vpack.c.bf16 %v723_v58, %v721_v57  ;;  %v677_v60 = vld [vmem:[%s3573_s20] sm:$0xff]  ;;  %v678_v61 = vld [vmem:[%s3573_s20 + $0x8] sm:$0xff]  ;;  %v679_v62 = vld [vmem:[%s3573_s20 + $0x10] sm:$0xff] }
 0x21a   : > { %2431 = vmatpush1.bf16.msra.mxu0 %v2430_v31  ;;  %v680_v63 = vld [vmem:[%s3573_s20 + $0x18] sm:$0xff]  ;;  %v681_v0 = vld [vmem:[%s3573_s20 + $0x20] sm:$0xff]  ;;  %v682_v1 = vld [vmem:[%s3573_s20 + $0x28] sm:$0xff] }
 0x21b   : > { %2433 = vmatprep.subr.bf16.mxu0 %v2432_v32  ;;  %v683_v2 = vld [vmem:[%s3573_s20 + $0x30] sm:$0xff]  ;;  %v684_v3 = vld [vmem:[%s3573_s20 + $0x38] sm:$0xff]  ;;  %v685_v4 = vld [vmem:[%s3573_s20 + $0x40] sm:$0xff] }
 0x21c   : > { %v686_v5 = vld [vmem:[%s3573_s20 + $0x48] sm:$0xff]  ;;  %v687_v6 = vld [vmem:[%s3573_s20 + $0x50] sm:$0xff]  ;;  %v688_v7 = vld [vmem:[%s3573_s20 + $0x58] sm:$0xff] }
 0x21d   : > { %v689_v8 = vld [vmem:[%s3573_s20 + $0x60] sm:$0xff]  ;;  %v690_v9 = vld [vmem:[%s3573_s20 + $0x68] sm:$0xff]  ;;  %v691_v10 = vld [vmem:[%s3573_s20 + $0x70] sm:$0xff] }
 0x21e   : > { %2435 = vmatpush1.bf16.msra.mxu0 %v2434_v37  ;;  %v692_v11 = vld [vmem:[%s3573_s20 + $0x78] sm:$0xff]  ;;  %v898_v12 = vld [vmem:[#allocation2] sm:$0xff] }
 0x21f   : > { %2437 = vmatprep.subr.bf16.mxu0 %v2436_v38  ;;  %2308 = vmatprep.mubr.f32.mxu1 %v898_v12  ;;  %v725_v16 = vld [vmem:[#allocation16] sm:$0x3] }
 0x220   : > { %v3674_v20 = vrot.slane %v725_v16, %v729_v15  ;;  %v3676_v22 = vrot.slane %v725_v16, %v733_v17 }
 0x222   : > { %2439 = vmatpush1.bf16.msra.mxu0 %v2438_v43 }
 0x223   : > { %2441 = vmatprep.subr.bf16.mxu0 %v2440_v44 }
 0x226   : > { %2443 = vmatpush1.bf16.msra.mxu0 %v2442_v49 }
 0x227   : > { %2445 = vmatprep.subr.bf16.mxu0 %v2444_v50 }
 0x22a   : > { %2447 = vmatpush1.bf16.msra.mxu0 %v2446_v55 }
 0x22b   : > { %2449 = vmatprep.subr.bf16.mxu0 %v2448_v56 }
 0x22e   : > { %2451 = vmatpush1.bf16.msra.mxu0 %v2450_v59 }
 0x231   : > { %802 = vmatmul.mubr.f32.vlgmr.msra.gmra.mrb[0].mxu0 %v677_v60 }
 0x232   : > { %807 = vmatprep.mubr.f32.mxu0 %v3163_v18 }
 0x235   : > { %808 = vmatmul.mubr.f32.gmra.mrb[2].mxu0 %v678_v61 }
 0x236   : > { %813 = vmatprep.mubr.f32.mxu0 %v3163_v18 }
 0x239   : > { %814 = vmatmul.mubr.f32.gmra.mrb[4].mxu0 %v679_v62 }
 0x23a   : > { %819 = vmatprep.mubr.f32.mxu0 %v3163_v18 }
 0x23d   : > { %820 = vmatmul.mubr.f32.gmra.mrb[6].mxu0 %v680_v63 }
 0x23e   : > { %825 = vmatprep.mubr.f32.mxu0 %v3163_v18 }
 0x241   : > { %826 = vmatmul.mubr.f32.gmra.mrb[8].mxu0 %v681_v0 }
 0x242   : > { %831 = vmatprep.mubr.f32.mxu0 %v3163_v18 }
 0x245   : > { %832 = vmatmul.mubr.f32.gmra.mrb[10].mxu0 %v682_v1 }
 0x246   : > { %837 = vmatprep.mubr.f32.mxu0 %v3163_v18 }
 0x249   : > { %838 = vmatmul.mubr.f32.gmra.mrb[12].mxu0 %v683_v2 }
 0x24a   : > { %843 = vmatprep.mubr.f32.mxu0 %v3163_v18 }
 0x24d   : > { %844 = vmatmul.mubr.f32.gmra.mrb[14].mxu0 %v684_v3 }
 0x24e   : > { %849 = vmatprep.mubr.f32.mxu0 %v3163_v18 }
 0x251   : > { %850 = vmatmul.mubr.f32.gmra.mrb[16].mxu0 %v685_v4 }
 0x252   : > { %855 = vmatprep.mubr.f32.mxu0 %v3163_v18 }
 0x255   : > { %856 = vmatmul.mubr.f32.gmra.mrb[18].mxu0 %v686_v5 }
 0x256   : > { %861 = vmatprep.mubr.f32.mxu0 %v3163_v18 }
 0x259   : > { %862 = vmatmul.mubr.f32.gmra.mrb[20].mxu0 %v687_v6 }
 0x25a   : > { %867 = vmatprep.mubr.f32.mxu0 %v3163_v18 }
 0x25d   : > { %868 = vmatmul.mubr.f32.gmra.mrb[22].mxu0 %v688_v7 }
 0x25e   : > { %873 = vmatprep.mubr.f32.mxu0 %v3163_v18 }
 0x261   : > { %874 = vmatmul.mubr.f32.gmra.mrb[24].mxu0 %v689_v8 }
 0x262   : > { %879 = vmatprep.mubr.f32.mxu0 %v3163_v18 }
 0x265   : > { %880 = vmatmul.mubr.f32.gmra.mrb[26].mxu0 %v690_v9 }
 0x266   : > { %885 = vmatprep.mubr.f32.mxu0 %v3163_v18 }
 0x269   : > { %886 = vmatmul.mubr.f32.gmra.mrb[28].mxu0 %v691_v10 }
 0x26a   : > { %891 = vmatprep.mubr.f32.mxu0 %v3163_v18 }
 0x26d   : > { %892 = vmatmul.mubr.f32.gmra.mrb[30].mxu0 %v692_v11 }
 0x304   : > { %v803_v19 = vpop.f32.mrb[0].mxu0 }
 0x305   : > { %v805_v21 = vpop.f32.mrb[1].mxu0  ;;  %v804_v24 = vadd.f32 %v803_v19, %v3674_v20 }
 0x306   : > { %v806_v26 = vadd.f32 %v805_v21, %v3676_v22 }
 0x308   : > { %v809_v23 = vpop.f32.mrb[2].mxu0 }
 0x309   : > { %v810_v18 = vadd.f32 %v809_v23, %v3674_v20  ;;  %v811_v25 = vpop.f32.mrb[3].mxu0 }
 0x30a   : > { %v812_v27 = vadd.f32 %v811_v25, %v3676_v22 }
 0x30b   : > { %v2452_v28 = vpack.c.bf16 %v810_v18, %v804_v24 }
 0x30c   : > { %v3682_v29 = vpack.c.bf16 %v812_v27, %v806_v26  ;;  %v815_v30 = vpop.f32.mrb[4].mxu0 }
 0x30d   : > { %v817_v31 = vpop.f32.mrb[5].mxu0  ;;  %2453 = vmatprep.subr.bf16.mxu1 %v2452_v28  ;;  %v816_v33 = vadd.f32 %v815_v30, %v3674_v20 }
 0x30e   : > { %2455 = vmatpush3.bf16.xpose.msra.mxu1 %v2452_v28  ;;  %2485 = vmatprep.subr.bf16.mxu0 %v3682_v29  ;;  %v818_v36 = vadd.f32 %v817_v31, %v3676_v22 }
 0x30f   : > { %2487 = vmatpush3.bf16.msra.mxu0 %v3682_v29 }
 0x310   : > { %v821_v32 = vpop.f32.mrb[6].mxu0 }
 0x311   : > { %v822_v34 = vadd.f32 %v821_v32, %v3674_v20  ;;  %v823_v35 = vpop.f32.mrb[7].mxu0 }
 0x312   : > { %v824_v37 = vadd.f32 %v823_v35, %v3676_v22 }
 0x313   : > { %v2456_v38 = vpack.c.bf16 %v822_v34, %v816_v33 }
 0x314   : > { %v3690_v39 = vpack.c.bf16 %v824_v37, %v818_v36  ;;  %v827_v40 = vpop.f32.mrb[8].mxu0 }
 0x315   : > { %v829_v41 = vpop.f32.mrb[9].mxu0  ;;  %2457 = vmatprep.subr.bf16.mxu1 %v2456_v38  ;;  %v828_v43 = vadd.f32 %v827_v40, %v3674_v20  ;;  %v899_v40 = vld [vmem:[#allocation2 + $0x8] sm:$0xff] }
 0x316   : > { %2459 = vmatpush3.bf16.xpose.msra.mxu1 %v2456_v38  ;;  %2489 = vmatprep.subr.bf16.mxu0 %v3690_v39  ;;  %v830_v46 = vadd.f32 %v829_v41, %v3676_v22  ;;  %v900_v41 = vld [vmem:[#allocation2 + $0x10] sm:$0xff] }
 0x317   : > { %2491 = vmatpush3.bf16.msra.mxu0 %v3690_v39 }
 0x318   : > { %v833_v42 = vpop.f32.mrb[10].mxu0 }
 0x319   : > { %v834_v44 = vadd.f32 %v833_v42, %v3674_v20  ;;  %v835_v45 = vpop.f32.mrb[11].mxu0  ;;  %v902_v42 = vld [vmem:[#allocation2 + $0x20] sm:$0xff] }
 0x31a   : > { %v836_v47 = vadd.f32 %v835_v45, %v3676_v22  ;;  %v907_v45 = vld [vmem:[#allocation2 + $0x48] sm:$0xff] }
 0x31b   : > { %v2460_v48 = vpack.c.bf16 %v834_v44, %v828_v43  ;;  %v904_v43 = vld [vmem:[#allocation2 + $0x30] sm:$0xff]  ;;  %v905_v44 = vld [vmem:[#allocation2 + $0x38] sm:$0xff] }
 0x31c   : > { %v3698_v49 = vpack.c.bf16 %v836_v47, %v830_v46  ;;  %v839_v50 = vpop.f32.mrb[12].mxu0  ;;  %v909_v46 = vld [vmem:[#allocation2 + $0x58] sm:$0xff]  ;;  %v910_v47 = vld [vmem:[#allocation2 + $0x60] sm:$0xff] }
 0x31d   : > { %v841_v51 = vpop.f32.mrb[13].mxu0  ;;  %2461 = vmatprep.subr.bf16.mxu1 %v2460_v48  ;;  %v840_v53 = vadd.f32 %v839_v50, %v3674_v20  ;;  %v913_v50 = vld [vmem:[#allocation2 + $0x78] sm:$0xff] }
 0x31e   : > { %2463 = vmatpush3.bf16.xpose.msra.mxu1 %v2460_v48  ;;  %2493 = vmatprep.subr.bf16.mxu0 %v3698_v49  ;;  %v842_v56 = vadd.f32 %v841_v51, %v3676_v22  ;;  %v911_v48 = vld [vmem:[#allocation2 + $0x68] sm:$0xff] }
 0x31f   : > { %2495 = vmatpush3.bf16.msra.mxu0 %v3698_v49 }
 0x320   : > { %v845_v52 = vpop.f32.mrb[14].mxu0 }
 0x321   : > { %v846_v54 = vadd.f32 %v845_v52, %v3674_v20  ;;  %v847_v55 = vpop.f32.mrb[15].mxu0 }
 0x322   : > { %v848_v57 = vadd.f32 %v847_v55, %v3676_v22 }
 0x323   : > { %v2464_v58 = vpack.c.bf16 %v846_v54, %v840_v53 }
 0x324   : > { %v3706_v59 = vpack.c.bf16 %v848_v57, %v842_v56  ;;  %v851_v60 = vpop.f32.mrb[16].mxu0 }
 0x325   : > { %v853_v61 = vpop.f32.mrb[17].mxu0  ;;  %2465 = vmatprep.subr.bf16.mxu1 %v2464_v58  ;;  %v852_v63 = vadd.f32 %v851_v60, %v3674_v20  ;;  %v3164_v60 = vmov 0  }
 0x326   : > { %2467 = vmatpush3.bf16.xpose.msra.mxu1 %v2464_v58  ;;  %2497 = vmatprep.subr.bf16.mxu0 %v3706_v59  ;;  %v854_v2 = vadd.f32 %v853_v61, %v3676_v22 }
 0x327   : > { %2499 = vmatpush3.bf16.msra.mxu0 %v3706_v59  ;;  %2723 = vset.pattern.permute.xlu1 %v3164_v60 }
 0x328   : > { %v857_v62 = vpop.f32.mrb[18].mxu0  ;;  %2724 = vset.pattern.permute.xlu0 %v3164_v60 }
 0x329   : > { %v858_v0 = vadd.f32 %v857_v62, %v3674_v20  ;;  %v859_v1 = vpop.f32.mrb[19].mxu0 }
 0x32a   : > { %v860_v3 = vadd.f32 %v859_v1, %v3676_v22 }
 0x32b   : > { %v2468_v4 = vpack.c.bf16 %v858_v0, %v852_v63 }
 0x32c   : > { %v3714_v5 = vpack.c.bf16 %v860_v3, %v854_v2  ;;  %v863_v6 = vpop.f32.mrb[20].mxu0 }
 0x32d   : > { %v865_v7 = vpop.f32.mrb[21].mxu0  ;;  %2469 = vmatprep.subr.bf16.mxu1 %v2468_v4  ;;  %v864_v9 = vadd.f32 %v863_v6, %v3674_v20 }
 0x32e   : > { %2471 = vmatpush3.bf16.xpose.msra.mxu1 %v2468_v4  ;;  %2501 = vmatprep.subr.bf16.mxu0 %v3714_v5  ;;  %v866_v12 = vadd.f32 %v865_v7, %v3676_v22  ;;  %v3794_v4 = vld [vmem:[#allocation3 + $0x8] sm:$0xff] }
 0x32f   : > { %2503 = vmatpush3.bf16.msra.mxu0 %v3714_v5 }
 0x330   : > { %v869_v8 = vpop.f32.mrb[22].mxu0 }
 0x331   : > { %v870_v10 = vadd.f32 %v869_v8, %v3674_v20  ;;  %v871_v11 = vpop.f32.mrb[23].mxu0 }
 0x332   : > { %v872_v13 = vadd.f32 %v871_v11, %v3676_v22 }
 0x333   : > { %v2472_v14 = vpack.c.bf16 %v870_v10, %v864_v9  ;;  %v3805_v10 = vld [vmem:[#allocation3 + $0x18] sm:$0xff] }
 0x334   : > { %v3722_v15 = vpack.c.bf16 %v872_v13, %v866_v12  ;;  %v875_v16 = vpop.f32.mrb[24].mxu0  ;;  %v3811_v13 = vld [vmem:[#allocation3 + $0x10] sm:$0xff] }
 0x335   : > { %v877_v17 = vpop.f32.mrb[25].mxu0  ;;  %2473 = vmatprep.subr.bf16.mxu1 %v2472_v14  ;;  %v876_v21 = vadd.f32 %v875_v16, %v3674_v20  ;;  %v3822_v16 = vld [vmem:[#allocation3 + $0x48] sm:$0xff] }
 0x336   : > { %2475 = vmatpush3.bf16.xpose.msra.mxu1 %v2472_v14  ;;  %2505 = vmatprep.subr.bf16.mxu0 %v3722_v15  ;;  %v878_v18 = vadd.f32 %v877_v17, %v3676_v22  ;;  %v3824_v17 = vld [vmem:[#allocation3 + $0x40] sm:$0xff] }
 0x337   : > { %2507 = vmatpush3.bf16.msra.mxu0 %v3722_v15 }
 0x338   : > { %v881_v19 = vpop.f32.mrb[26].mxu0 }
 0x339   : > { %v882_v23 = vadd.f32 %v881_v19, %v3674_v20  ;;  %v883_v24 = vpop.f32.mrb[27].mxu0 }
 0x33a   : > { %v884_v25 = vadd.f32 %v883_v24, %v3676_v22 }
 0x33b   : > { %v2476_v26 = vpack.c.bf16 %v882_v23, %v876_v21 }
 0x33c   : > { %v2508_v27 = vpack.c.bf16 %v884_v25, %v878_v18  ;;  %v887_v28 = vpop.f32.mrb[28].mxu0  ;;  %v3832_v18 = vld [vmem:[#allocation3 + $0x58] sm:$0xff]  ;;  %v3836_v25 = vld [vmem:[#allocation3 + $0x20] sm:$0xff] }
 0x33d   : > { %v889_v30 = vpop.f32.mrb[29].mxu0  ;;  %2477 = vmatprep.subr.bf16.mxu1 %v2476_v26  ;;  %v888_v32 = vadd.f32 %v887_v28, %v3674_v20 }
 0x33e   : > { %2479 = vmatpush3.bf16.xpose.msra.mxu1 %v2476_v26  ;;  %2509 = vmatprep.subr.bf16.mxu0 %v2508_v27  ;;  %v890_v35 = vadd.f32 %v889_v30, %v3676_v22 }
 0x33f   : > { %2511 = vmatpush3.bf16.msra.mxu0 %v2508_v27 }
 0x340   : > { %v893_v31 = vpop.f32.mrb[30].mxu0 }
 0x341   : > { %v894_v33 = vadd.f32 %v893_v31, %v3674_v20  ;;  %v895_v34 = vpop.f32.mrb[31].mxu0  ;;  %v901_v20 = vld [vmem:[#allocation2 + $0x18] sm:$0xff]  ;;  %v3846_v31 = vld [vmem:[#allocation3 + $0x50] sm:$0xff] }
 0x342   : > { %v896_v36 = vadd.f32 %v895_v34, %v3676_v22  ;;  %v903_v22 = vld [vmem:[#allocation2 + $0x28] sm:$0xff] }
 0x343   : > { %v2480_v37 = vpack.c.bf16 %v894_v33, %v888_v32  ;;  %v1064_v32 = vld [vmem:[#allocation3 + $0x28] sm:$0xff] }
 0x344   : > { %v2512_v38 = vpack.c.bf16 %v896_v36, %v890_v35 }
 0x345   : > { %2481 = vmatprep.subr.bf16.mxu1 %v2480_v37 }
 0x346   : > { %2483 = vmatpush3.bf16.xpose.msra.mxu1 %v2480_v37  ;;  %2513 = vmatprep.subr.bf16.mxu0 %v2512_v38  ;;  %v3856_v37 = vld [vmem:[#allocation3 + $0x68] sm:$0xff] }
 0x347   : > { %2532 = vmatprep.subr.bf16.mxu1 %v3682_v29  ;;  %2515 = vmatpush3.bf16.msra.mxu0 %v2512_v38 }
 0x34d   : > { %2309 = vmatmul.mubr.f32.vlgmr.msra.gmra.mrb[0].mxu1 %v899_v40 }
 0x34e   : > { %2540 = vmatpush3.bf16.msra.mxu1 %v3682_v29  ;;  %2311 = vmatprep.mubr.f32.mxu1 %v900_v41  ;;  %v906_v29 = vld [vmem:[#allocation2 + $0x40] sm:$0xff] }
 0x34f   : > { %2533 = vmatprep.subr.bf16.mxu1 %v3690_v39 }
 0x351   : > { %2312 = vmatmul.mubr.f32.gmra.mrb[2].mxu1 %v901_v20 }
 0x352   : > { %2541 = vmatpush3.bf16.msra.mxu1 %v3690_v39  ;;  %2314 = vmatprep.mubr.f32.mxu1 %v902_v42  ;;  %v908_v39 = vld [vmem:[#allocation2 + $0x50] sm:$0xff] }
 0x353   : > { %2534 = vmatprep.subr.bf16.mxu1 %v3698_v49 }
 0x355   : > { %2315 = vmatmul.mubr.f32.gmra.mrb[4].mxu1 %v903_v22  ;;  %v3868_v22 = vld [vmem:[#allocation3 + $0x60] sm:$0xff] }
 0x356   : > { %2542 = vmatpush3.bf16.msra.mxu1 %v3698_v49  ;;  %2317 = vmatprep.mubr.f32.mxu1 %v904_v43  ;;  %v912_v49 = vld [vmem:[#allocation2 + $0x70] sm:$0xff]  ;;  %v1066_v43 = vld [vmem:[#allocation3 + $0x38] sm:$0xff] }
 0x357   : > { %2535 = vmatprep.subr.bf16.mxu1 %v3706_v59 }
 0x359   : > { %2318 = vmatmul.mubr.f32.gmra.mrb[6].mxu1 %v905_v44 }
 0x35a   : > { %2543 = vmatpush3.bf16.msra.mxu1 %v3706_v59  ;;  %2320 = vmatprep.mubr.f32.mxu1 %v906_v29 }
 0x35b   : > { %2536 = vmatprep.subr.bf16.mxu1 %v3714_v5 }
 0x35d   : > { %2321 = vmatmul.mubr.f32.gmra.mrb[8].mxu1 %v907_v45 }
 0x35e   : > { %2544 = vmatpush3.bf16.msra.mxu1 %v3714_v5  ;;  %2323 = vmatprep.mubr.f32.mxu1 %v908_v39  ;;  %v3796_v5 = vld [vmem:[#allocation3] sm:$0xff] }
 0x35f   : > { %2537 = vmatprep.subr.bf16.mxu1 %v3722_v15 }
 0x361   : > { %2324 = vmatmul.mubr.f32.gmra.mrb[10].mxu1 %v909_v46 }
 0x362   : > { %2545 = vmatpush3.bf16.msra.mxu1 %v3722_v15  ;;  %2326 = vmatprep.mubr.f32.mxu1 %v910_v47  ;;  %v3879_v47 = vld [vmem:[#allocation3 + $0x78] sm:$0xff] }
 0x363   : > { %2538 = vmatprep.subr.bf16.mxu1 %v2508_v27 }
 0x365   : > { %2327 = vmatmul.mubr.f32.gmra.mrb[12].mxu1 %v911_v48 }
 0x366   : > { %2546 = vmatpush3.bf16.msra.mxu1 %v2508_v27  ;;  %2329 = vmatprep.mubr.f32.mxu1 %v912_v49 }
 0x367   : > { %2539 = vmatprep.subr.bf16.mxu1 %v2512_v38 }
 0x369   : > { %2330 = vmatmul.mubr.f32.gmra.mrb[14].mxu1 %v913_v50 }
 0x36a   : > { %2547 = vmatpush3.bf16.msra.mxu1 %v2512_v38  ;;  %v3860_v38 = vld [vmem:[#allocation3 + $0x30] sm:$0xff] }
 0x420   : > { %v3746_v51 = vpop.f32.mrb[0].mxu1 }
 0x421   : > { %1077 = vmax.xlane.f32.xlu1 %v3746_v51  ;;  %v3749_v52 = vpop.f32.mrb[1].mxu1 }
 0x422   : > { %1075 = vmax.xlane.f32.xlu0 %v3749_v52 }
 0x424   : > { %v3752_v53 = vpop.f32.mrb[2].mxu1 }
 0x425   : > { %v3754_v54 = vpop.f32.mrb[3].mxu1 }
 0x426   : > { %1081 = vmax.xlane.f32.xlu0 %v3752_v53 }
 0x428   : > { %v3757_v55 = vpop.f32.mrb[4].mxu1 }
 0x429   : > { %v3759_v56 = vpop.f32.mrb[5].mxu1 }
 0x42a   : > { %1079 = vmax.xlane.f32.xlu0 %v3754_v54 }
 0x42c   : > { %v3762_v57 = vpop.f32.mrb[6].mxu1 }
 0x42d   : > { %v3764_v58 = vpop.f32.mrb[7].mxu1 }
 0x430   : > { %v3766_v59 = vpop.f32.mrb[8].mxu1 }
 0x431   : > { %1093 = vmax.xlane.f32.xlu1 %v3766_v59  ;;  %v3769_v61 = vpop.f32.mrb[9].mxu1 }
 0x432   : > { %1091 = vmax.xlane.f32.xlu0 %v3769_v61 }
 0x434   : > { %v3772_v62 = vpop.f32.mrb[10].mxu1 }
 0x435   : > { %1097 = vmax.xlane.f32.xlu1 %v3772_v62  ;;  %v3775_v63 = vpop.f32.mrb[11].mxu1 }
 0x436   : > { %1083 = vmax.xlane.f32.xlu0 %v3759_v56 }
 0x438   : > { %v3778_v0 = vpop.f32.mrb[12].mxu1 }
 0x439   : > { %1095 = vmax.xlane.f32.xlu1 %v3775_v63  ;;  %v3781_v1 = vpop.f32.mrb[13].mxu1 }
 0x43a   : > { %1085 = vmax.xlane.f32.xlu0 %v3757_v55 }
 0x43c   : > { %v3784_v2 = vpop.f32.mrb[14].mxu1 }
 0x43d   : > { %1101 = vmax.xlane.f32.xlu1 %v3778_v0  ;;  %v3787_v3 = vpop.f32.mrb[15].mxu1 }
 0x43e   : > { %1087 = vmax.xlane.f32.xlu0 %v3764_v58 }
 0x441   : > { %1099 = vmax.xlane.f32.xlu1 %v3781_v1 }
 0x442   : > { %1089 = vmax.xlane.f32.xlu0 %v3762_v57 }
 0x445   : > { %1105 = vmax.xlane.f32.xlu1 %v3784_v2 }
 0x449   : > { %1103 = vmax.xlane.f32.xlu1 %v3787_v3 }
 0x4ae   : > { %v1078_v6 = vpop.xlane.xlu1 %1077 }
 0x4af   : > { %v3799_v7 = vmax.f32 %v3794_v4, %v1078_v6  ;;  %v1076_v8 = vpop.xlane.xlu0 %1075  ;;  %v3893_v6 = vld [vmem:[#allocation3 + $0x70] sm:$0xff] }
 0x4b0   : > { %v1107_v9 = vmax.f32 %v3796_v5, %v1076_v8 }
 0x4b1   : > { %1686 = vst.msk [vmem:[#allocation3 + $0x8] sm:$0xff] %vm1379_vm1, %v3799_v7  ;;  %1178 = vperm.xlu1 %2723, %v3799_v7   ;;  %v1124_v60 = vsub.f32 %v3794_v4, %v3799_v7 }
 0x4b2   : > { %1685 = vst.msk [vmem:[#allocation3] sm:$0xff] %vm1379_vm1, %v1107_v9  ;;  %1173 = vperm.xlu0 %2724, %v1107_v9   ;;  %v1123_v44 = vsub.f32 %v3796_v5, %v1107_v9 }
 0x4b3   : > { %v1082_v11 = vpop.xlane.xlu0 %1081 }
 0x4b4   : > { %v3809_v12 = vmax.f32 %v3805_v10, %v1082_v11  ;;  %v1139_v48 = vmul.f32 1.442695, %v1123_v44 }
 0x4b6   : > { %1688 = vst.msk [vmem:[#allocation3 + $0x18] sm:$0xff] %vm1379_vm1, %v3809_v12  ;;  %1188 = vperm.xlu1 %2723, %v3809_v12   ;;  %v1126_v49 = vsub.f32 %v3805_v10, %v3809_v12  ;;  %2725 = vpow2.f32 %v1139_v48  ;;  %v1141_v12 = vmul.f32 1.442695, %v1124_v60 }
 0x4b7   : > { %v1080_v14 = vpop.xlane.xlu0 %1079 }
 0x4b8   : > { %v3817_v15 = vmax.f32 %v3811_v13, %v1080_v14  ;;  %v1145_v9 = vmul.f32 1.442695, %v1126_v49 }
 0x4ba   : > { %1687 = vst.msk [vmem:[#allocation3 + $0x10] sm:$0xff] %vm1379_vm1, %v3817_v15  ;;  %1183 = vperm.xlu1 %2723, %v3817_v15   ;;  %v1125_v4 = vsub.f32 %v3811_v13, %v3817_v15  ;;  %2727 = vpow2.f32 %v1145_v9 }
 0x4bb   : > { %2729 = vpow2.f32 %v1141_v12 }
 0x4be   : > { %v1094_v19 = vpop.xlane.xlu1 %1093 }
 0x4bf   : > { %v3827_v21 = vmax.f32 %v3822_v16, %v1094_v19  ;;  %v1092_v23 = vpop.xlane.xlu0 %1091 }
 0x4c0   : > { %v3830_v24 = vmax.f32 %v3824_v17, %v1092_v23 }
 0x4c1   : > { %1694 = vst.msk [vmem:[#allocation3 + $0x48] sm:$0xff] %vm1379_vm1, %v3827_v21  ;;  %v1132_v15 = vsub.f32 %v3822_v16, %v3827_v21 }
 0x4c2   : > { %1693 = vst.msk [vmem:[#allocation3 + $0x40] sm:$0xff] %vm1379_vm1, %v3830_v24  ;;  %v1098_v26 = vpop.xlane.xlu1 %1097  ;;  %v1131_v16 = vsub.f32 %v3824_v17, %v3830_v24 }
 0x4c3   : > { %v3841_v27 = vmax.f32 %v3832_v18, %v1098_v26  ;;  %v1084_v28 = vpop.xlane.xlu0 %1083  ;;  %v1143_v26 = vmul.f32 1.442695, %v1125_v4 }
 0x4c4   : > { %v3844_v30 = vmax.f32 %v3836_v25, %v1084_v28 }
 0x4c5   : > { %1696 = vst.msk [vmem:[#allocation3 + $0x58] sm:$0xff] %vm1379_vm1, %v3841_v27 }
 0x4c6   : > { %1689 = vst.msk [vmem:[#allocation3 + $0x20] sm:$0xff] %vm1379_vm1, %v3844_v30  ;;  %v1096_v33 = vpop.xlane.xlu1 %1095  ;;  %1193 = vperm.xlu1 %2723, %v3844_v30   ;;  %v1127_v13 = vsub.f32 %v3836_v25, %v3844_v30  ;;  %v1134_v25 = vsub.f32 %v3832_v18, %v3841_v27  ;;  %v1155_v18 = vmul.f32 1.442695, %v1131_v16 }
 0x4c7   : > { %v3854_v34 = vmax.f32 %v3846_v31, %v1096_v33  ;;  %v1086_v35 = vpop.xlane.xlu0 %1085 }
 0x4c8   : > { %v1112_v36 = vmax.f32 %v1064_v32, %v1086_v35  ;;  %v3916_v35 = vpop.eup %2725 }
 0x4c9   : > { %1695 = vst.msk [vmem:[#allocation3 + $0x50] sm:$0xff] %vm1379_vm1, %v3854_v34  ;;  %v3923_v30 = vpop.eup %2727 }
 0x4ca   : > { %1690 = vst.msk [vmem:[#allocation3 + $0x28] sm:$0xff] %vm1379_vm1, %v1112_v36  ;;  %v1102_v40 = vpop.xlane.xlu1 %1101  ;;  %1218 = vperm.xlu1 %2723, %v3827_v21   ;;  %v1128_v10 = vsub.f32 %v1064_v32, %v1112_v36  ;;  %v1147_v32 = vmul.f32 1.442695, %v1127_v13 }
 0x4cb   : > { %v3865_v41 = vmax.f32 %v3856_v37, %v1102_v40  ;;  %v1088_v20 = vpop.xlane.xlu0 %1087  ;;  %v3925_v40 = vpop.eup %2729 }
 0x4cc   : > { %v1113_v42 = vmax.f32 %v3860_v38, %v1088_v20  ;;  %v1149_v19 = vmul.f32 1.442695, %v1128_v10 }
 0x4cd   : > { %1698 = vst.msk [vmem:[#allocation3 + $0x68] sm:$0xff] %vm1379_vm1, %v3865_v41  ;;  %1238 = vperm.xlu0 %2724, %v3865_v41   ;;  %v1136_v20 = vsub.f32 %v3856_v37, %v3865_v41 }
 0x4ce   : > { %1691 = vst.msk [vmem:[#allocation3 + $0x30] sm:$0xff] %vm1379_vm1, %v1113_v42  ;;  %v1100_v29 = vpop.xlane.xlu1 %1099  ;;  %1213 = vperm.xlu1 %2723, %v3830_v24   ;;  %2731 = vpow2.f32 %v1149_v19  ;;  %v1129_v33 = vsub.f32 %v3860_v38, %v1113_v42  ;;  %v1161_v38 = vmul.f32 1.442695, %v1134_v25 }
 0x4cf   : > { %v3877_v45 = vmax.f32 %v3868_v22, %v1100_v29  ;;  %v1090_v39 = vpop.xlane.xlu0 %1089  ;;  %2733 = vpow2.f32 %v1143_v26 }
 0x4d0   : > { %v1114_v46 = vmax.f32 %v1066_v43, %v1090_v39  ;;  %v1151_v21 = vmul.f32 1.442695, %v1129_v33 }
 0x4d1   : > { %1697 = vst.msk [vmem:[#allocation3 + $0x60] sm:$0xff] %vm1379_vm1, %v3877_v45  ;;  %1233 = vperm.xlu0 %2724, %v3877_v45   ;;  %v1135_v37 = vsub.f32 %v3868_v22, %v3877_v45 }
 0x4d2   : > { %1692 = vst.msk [vmem:[#allocation3 + $0x38] sm:$0xff] %vm1379_vm1, %v1114_v46  ;;  %v1106_v50 = vpop.xlane.xlu1 %1105  ;;  %1228 = vperm.xlu1 %2723, %v3841_v27   ;;  %v1130_v23 = vsub.f32 %v1066_v43, %v1114_v46  ;;  %v1133_v27 = vsub.f32 %v3846_v31, %v3854_v34 }
 0x4d3   : > { %v3891_v5 = vmax.f32 %v3879_v47, %v1106_v50  ;;  %v1163_v31 = vmul.f32 1.442695, %v1135_v37 }
 0x4d4   : > { %v1153_v28 = vmul.f32 1.442695, %v1130_v23  ;;  %v1159_v43 = vmul.f32 1.442695, %v1133_v27 }
 0x4d5   : > { %v1138_v8 = vsub.f32 %v3879_v47, %v3891_v5  ;;  %1700 = vst.msk [vmem:[#allocation3 + $0x78] sm:$0xff] %vm1379_vm1, %v3891_v5 }
 0x4d6   : > { %1223 = vperm.xlu1 %2723, %v3854_v34   ;;  %v1104_v11 = vpop.xlane.xlu1 %1103  ;;  %2735 = vpow2.f32 %v1153_v28 }
 0x4d7   : > { %v3903_v7 = vmax.f32 %v3893_v6, %v1104_v11  ;;  %2737 = vpow2.f32 %v1147_v32 }
 0x4d8   : > { %v3933_v17 = vpop.eup %2731 }
 0x4d9   : > { %v1137_v14 = vsub.f32 %v3893_v6, %v3903_v7  ;;  %1699 = vst.msk [vmem:[#allocation3 + $0x70] sm:$0xff] %vm1379_vm1, %v3903_v7  ;;  %1243 = vperm.xlu0 %2724, %v3903_v7   ;;  %v3935_v24 = vpop.eup %2733 }
 0x4da   : > { %1198 = vperm.xlu1 %2723, %v1112_v36   ;;  %v1157_v36 = vmul.f32 1.442695, %v1132_v15 }
 0x4dc   : > { %2739 = vpow2.f32 %v1157_v36 }
 0x4dd   : > { %1248 = vperm.xlu0 %2724, %v3891_v5   ;;  %2741 = vpow2.f32 %v1151_v21 }
 0x4de   : > { %1203 = vperm.xlu1 %2723, %v1113_v42   ;;  %2743 = vpow2.f32 %v1161_v38  ;;  %v1165_v42 = vmul.f32 1.442695, %v1136_v20 }
 0x4df   : > { %2745 = vpow2.f32 %v1155_v18 }
 0x4e0   : > { %v3941_v41 = vpop.eup %2735  ;;  %2747 = vpow2.f32 %v1165_v42 }
 0x4e1   : > { %1414 = vperm.xlu0 %2724, %v3916_v35   ;;  %v3943_v44 = vpop.eup %2737  ;;  %2749 = vpow2.f32 %v1159_v43 }
 0x4e2   : > { %1208 = vperm.xlu1 %2723, %v1114_v46   ;;  %2751 = vpow2.f32 %v1163_v31 }
 0x4e5   : > { %1429 = vperm.xlu0 %2724, %v3923_v30  }
 0x4e6   : > { %1419 = vperm.xlu1 %2723, %v3925_v40   ;;  %v3947_v34 = vpop.eup %2739 }
 0x4e7   : > { %v3949_v29 = vpop.eup %2741 }
 0x4e8   : > { %v3953_v22 = vpop.eup %2743 }
 0x4e9   : > { %1439 = vperm.xlu0 %2724, %v3933_v17   ;;  %v3955_v45 = vpop.eup %2745 }
 0x4ea   : > { %1424 = vperm.xlu1 %2723, %v3935_v24   ;;  %v3959_v39 = vpop.eup %2747 }
 0x4eb   : > { %v3961_v46 = vpop.eup %2749 }
 0x4ec   : > { %v3965_v48 = vpop.eup %2751 }
 0x4ed   : > { %1449 = vperm.xlu0 %2724, %v3941_v41  }
 0x4ee   : > { %1434 = vperm.xlu1 %2723, %v3943_v44  }
 0x4f1   : > { %1459 = vperm.xlu0 %2724, %v3947_v34  }
 0x4f2   : > { %1444 = vperm.xlu1 %2723, %v3949_v29  }
 0x4f5   : > { %1469 = vperm.xlu0 %2724, %v3953_v22  }
 0x4f6   : > { %1454 = vperm.xlu1 %2723, %v3955_v45  }
 0x4f9   : > { %1479 = vperm.xlu0 %2724, %v3959_v39  }
 0x4fa   : > { %1464 = vperm.xlu1 %2723, %v3961_v46  }
 0x4fe   : > { %1474 = vperm.xlu1 %2723, %v3965_v48  }
 0x530   : > { %v1179_v49 = vpop.permute.xlu1 %1178 }
 0x531   : > { %v1252_v50 = vsub.f32 %v3746_v51, %v1179_v49  ;;  %v1174_v60 = vpop.permute.xlu0 %1173 }
 0x532   : > { %v1251_v9 = vsub.f32 %v3749_v52, %v1174_v60 }
 0x533   : > { %v1269_v10 = vmul.f32 1.442695, %v1252_v50 }
 0x534   : > { %v1267_v11 = vmul.f32 1.442695, %v1251_v9 }
 0x535   : > { %2753 = vpow2.f32 %v1269_v10  ;;  %v1189_v12 = vpop.permute.xlu1 %1188 }
 0x536   : > { %2755 = vpow2.f32 %v1267_v11  ;;  %v1254_v4 = vsub.f32 %v3752_v53, %v1189_v12 }
 0x538   : > { %v1273_v19 = vmul.f32 1.442695, %v1254_v4 }
 0x539   : > { %v1184_v23 = vpop.permute.xlu1 %1183 }
 0x53a   : > { %2757 = vpow2.f32 %v1273_v19  ;;  %v1253_v26 = vsub.f32 %v3754_v54, %v1184_v23 }
 0x53c   : > { %v1271_v13 = vmul.f32 1.442695, %v1253_v26 }
 0x53e   : > { %2759 = vpow2.f32 %v1271_v13 }
 0x53f   : > { %v2754_v15 = vpop.eup %2753 }
 0x540   : > { %v2756_v28 = vpop.eup %2755  ;;  %1333 = vadd.xlane.f32.xlu0 %v2754_v15 }
 0x541   : > { %2364 = vmatprep.mubr.f32.mxu0 %v2756_v28  ;;  %1331 = vadd.xlane.f32.xlu1 %v2756_v28 }
 0x542   : > { %2365 = vmatmul.mubr.f32.vlgmr.msra.gmra.mrb[32].mxu0 %v2754_v15 }
 0x544   : > { %v2758_v51 = vpop.eup %2757 }
 0x545   : > { %1337 = vadd.xlane.f32.xlu1 %v2758_v51  ;;  %v1194_v52 = vpop.permute.xlu1 %1193 }
 0x546   : > { %v1255_v32 = vsub.f32 %v3759_v56, %v1194_v52 }
 0x548   : > { %v2760_v33 = vpop.eup %2759  ;;  %v1275_v53 = vmul.f32 1.442695, %v1255_v32 }
 0x549   : > { %1335 = vadd.xlane.f32.xlu0 %v2760_v33  ;;  %2367 = vmatprep.mubr.f32.mxu0 %v2760_v33  ;;  %v1219_v36 = vpop.permute.xlu1 %1218 }
 0x54a   : > { %2761 = vpow2.f32 %v1275_v53  ;;  %2368 = vmatmul.mubr.f32.gmra.mrb[34].mxu0 %v2758_v51  ;;  %v1260_v54 = vsub.f32 %v3766_v59, %v1219_v36 }
 0x54c   : > { %v1239_v25 = vpop.permute.xlu0 %1238  ;;  %v1285_v38 = vmul.f32 1.442695, %v1260_v54  ;;  %v1167_v54 = vmul.f32 1.442695, %v1137_v14 }
 0x54d   : > { %v1214_v16 = vpop.permute.xlu1 %1213  ;;  %v1264_v31 = vsub.f32 %v3778_v0, %v1239_v25  ;;  %v1169_v25 = vmul.f32 1.442695, %v1138_v8 }
 0x54e   : > { %v1259_v21 = vsub.f32 %v3769_v61, %v1214_v16 }
 0x54f   : > { %v1293_v11 = vmul.f32 1.442695, %v1264_v31  ;;  %v1299_v31 = vld [vmem:[#allocation4] sm:$0xff] }
 0x550   : > { %v1283_v20 = vmul.f32 1.442695, %v1259_v21  ;;  %v1234_v18 = vpop.permute.xlu0 %1233 }
 0x551   : > { %v1229_v27 = vpop.permute.xlu1 %1228  ;;  %v1263_v43 = vsub.f32 %v3781_v1, %v1234_v18 }
 0x552   : > { %2763 = vpow2.f32 %v1283_v20  ;;  %v1262_v56 = vsub.f32 %v3772_v62, %v1229_v27 }
 0x553   : > { %2765 = vpow2.f32 %v1285_v38  ;;  %v1291_v61 = vmul.f32 1.442695, %v1263_v43 }
 0x554   : > { %v2762_v42 = vpop.eup %2761  ;;  %v1289_v49 = vmul.f32 1.442695, %v1262_v56 }
 0x555   : > { %1339 = vadd.xlane.f32.xlu0 %v2762_v42  ;;  %2370 = vmatprep.mubr.f32.mxu0 %v2762_v42  ;;  %v1224_v37 = vpop.permute.xlu1 %1223 }
 0x556   : > { %v1261_v59 = vsub.f32 %v3775_v63, %v1224_v37  ;;  %v1300_v37 = vld [vmem:[#allocation4 + $0x8] sm:$0xff] }
 0x558   : > { %v1287_v50 = vmul.f32 1.442695, %v1261_v59  ;;  %v1244_v60 = vpop.permute.xlu0 %1243 }
 0x559   : > { %v1265_v9 = vsub.f32 %v3787_v3, %v1244_v60  ;;  %v1199_v10 = vpop.permute.xlu1 %1198 }
 0x55a   : > { %2767 = vpow2.f32 %v1287_v50  ;;  %v1256_v62 = vsub.f32 %v3757_v55, %v1199_v10  ;;  %v1315_v50 = vmul.f32 %v3916_v35, %v1299_v31  ;;  %v1302_v10 = vld [vmem:[#allocation4 + $0x18] sm:$0xff]  ;;  %v1303_v35 = vld [vmem:[#allocation4 + $0x20] sm:$0xff] }
 0x55b   : > { %2769 = vpow2.f32 %v1289_v49  ;;  %v1295_v12 = vmul.f32 1.442695, %v1265_v9  ;;  %v1316_v49 = vmul.f32 %v3925_v40, %v1300_v37  ;;  %v1311_v31 = vld [vmem:[#allocation4 + $0x60] sm:$0xff] }
 0x55c   : > { %v2764_v1 = vpop.eup %2763  ;;  %2771 = vpow2.f32 %v1291_v61  ;;  %v1277_v4 = vmul.f32 1.442695, %v1256_v62  ;;  %v1249_v19 = vpop.permute.xlu0 %1248 }
 0x55d   : > { %v2766_v63 = vpop.eup %2765  ;;  %v1266_v0 = vsub.f32 %v3784_v2, %v1249_v19  ;;  %2376 = vmatprep.mubr.f32.mxu1 %v2764_v1  ;;  %v1204_v23 = vpop.permute.xlu1 %1203 }
 0x55e   : > { %2773 = vpow2.f32 %v1277_v4  ;;  %v1257_v26 = vsub.f32 %v3764_v58, %v1204_v23  ;;  %2377 = vmatmul.mubr.f32.vlgmr.msra.gmra.mrb[16].mxu1 %v2766_v63 }
 0x55f   : > { %2775 = vpow2.f32 %v1293_v11  ;;  %v1297_v3 = vmul.f32 1.442695, %v1266_v0  ;;  %v1318_v11 = vmul.f32 %v3923_v30, %v1302_v10  ;;  %v1319_v0 = vmul.f32 %v3943_v44, %v1303_v35  ;;  %v1313_v10 = vld [vmem:[#allocation4 + $0x70] sm:$0xff] }
 0x560   : > { %2777 = vpow2.f32 %v1295_v12  ;;  %v1279_v55 = vmul.f32 1.442695, %v1257_v26  ;;  %v3996_v38 = vpop.permute.xlu0 %1414  ;;  %v1301_v12 = vld [vmem:[#allocation4 + $0x10] sm:$0xff] }
 0x561   : > { %v1209_v13 = vpop.permute.xlu1 %1208  ;;  %v1317_v40 = vmul.f32 %v3935_v24, %v1301_v12 }
 0x562   : > { %2779 = vpow2.f32 %v1279_v55  ;;  %v1258_v15 = vsub.f32 %v3762_v57, %v1209_v13  ;;  %v1305_v13 = vld [vmem:[#allocation4 + $0x30] sm:$0xff] }
 0x563   : > { %2781 = vpow2.f32 %v1297_v3  ;;  %v1304_v3 = vld [vmem:[#allocation4 + $0x28] sm:$0xff]  ;;  %v1321_v24 = vmul.f32 %v3949_v29, %v1305_v13  ;;  %v1399_v13 = vld [vmem:[#allocation5 + $0x18] sm:$0xff] }
 0x564   : > { %v2768_v28 = vpop.eup %2767  ;;  %v1281_v51 = vmul.f32 1.442695, %v1258_v15  ;;  %v4000_v6 = vpop.permute.xlu0 %1429  ;;  %v1320_v30 = vmul.f32 %v3933_v17, %v1304_v3  ;;  %v1309_v17 = vld [vmem:[#allocation4 + $0x50] sm:$0xff] }
 0x565   : > { %v2770_v52 = vpop.eup %2769  ;;  %2379 = vmatprep.mubr.f32.mxu1 %v2768_v28  ;;  %v3998_v20 = vpop.permute.xlu1 %1419  ;;  %v1325_v29 = vmul.f32 %v3961_v46, %v1309_v17  ;;  %v1312_v46 = vld [vmem:[#allocation4 + $0x68] sm:$0xff] }
 0x566   : > { %v2772_v2 = vpop.eup %2771  ;;  %2783 = vpow2.f32 %v1281_v51  ;;  %2380 = vmatmul.mubr.f32.gmra.mrb[18].mxu1 %v2770_v52  ;;  %v1307_v51 = vld [vmem:[#allocation4 + $0x40] sm:$0xff] }
 0x567   : > { %2382 = vmatprep.mubr.f32.mxu1 %v2772_v2  ;;  %2785 = vpow2.f32 %v1167_v54  ;;  %v1323_v44 = vmul.f32 %v3955_v45, %v1307_v51  ;;  %v1310_v45 = vld [vmem:[#allocation4 + $0x58] sm:$0xff] }
 0x568   : > { %v2774_v32 = vpop.eup %2773  ;;  %2787 = vpow2.f32 %v1169_v25  ;;  %v4004_v47 = vpop.permute.xlu0 %1439 }
 0x569   : > { %v2776_v58 = vpop.eup %2775  ;;  %1341 = vadd.xlane.f32.xlu1 %v2774_v32  ;;  %2371 = vmatmul.mubr.f32.gmra.mrb[36].mxu0 %v2774_v32  ;;  %v4002_v7 = vpop.permute.xlu1 %1424 }
 0x56a   : > { %v2778_v33 = vpop.eup %2777  ;;  %2383 = vmatmul.mubr.f32.gmra.mrb[20].mxu1 %v2776_v58 }
 0x56b   : > { %2385 = vmatprep.mubr.f32.mxu1 %v2778_v33 }
 0x56c   : > { %v2780_v53 = vpop.eup %2779  ;;  %v4008_v8 = vpop.permute.xlu0 %1449 }
 0x56d   : > { %v2782_v36 = vpop.eup %2781  ;;  %1343 = vadd.xlane.f32.xlu0 %v2780_v53  ;;  %2373 = vmatprep.mubr.f32.mxu0 %v2780_v53  ;;  %v4006_v5 = vpop.permute.xlu1 %1434  ;;  %v1308_v53 = vld [vmem:[#allocation4 + $0x48] sm:$0xff] }
 0x56e   : > { %2386 = vmatmul.mubr.f32.gmra.mrb[22].mxu1 %v2782_v36  ;;  %v1324_v54 = vmul.f32 %v3947_v34, %v1308_v53 }
 0x570   : > { %v2784_v57 = vpop.eup %2783  ;;  %v4012_v18 = vpop.permute.xlu0 %1459 }
 0x571   : > { %1347 = vadd.xlane.f32.xlu0 %v2764_v1  ;;  %1345 = vadd.xlane.f32.xlu1 %v2784_v57  ;;  %v3990_v16 = vpop.eup %2785  ;;  %v4010_v14 = vpop.permute.xlu1 %1444 }
 0x572   : > { %2374 = vmatmul.mubr.f32.gmra.mrb[38].mxu0 %v2784_v57  ;;  %v3992_v21 = vpop.eup %2787 }
 0x574   : > { %v4016_v56 = vpop.permute.xlu0 %1469 }
 0x575   : > { %1351 = vadd.xlane.f32.xlu0 %v2768_v28  ;;  %1349 = vadd.xlane.f32.xlu1 %v2766_v63  ;;  %v4014_v27 = vpop.permute.xlu1 %1454 }
 0x578   : > { %v4020_v43 = vpop.permute.xlu0 %1479 }
 0x579   : > { %1355 = vadd.xlane.f32.xlu0 %v2772_v2  ;;  %1353 = vadd.xlane.f32.xlu1 %v2770_v52  ;;  %v4018_v42 = vpop.permute.xlu1 %1464  ;;  %v1306_v52 = vld [vmem:[#allocation4 + $0x38] sm:$0xff] }
 0x57a   : > { %v1322_v32 = vmul.f32 %v3941_v41, %v1306_v52 }
 0x57d   : > { %1359 = vadd.xlane.f32.xlu0 %v2778_v33  ;;  %1357 = vadd.xlane.f32.xlu1 %v2776_v58  ;;  %v4022_v59 = vpop.permute.xlu1 %1474 }
 0x581   : > { %1361 = vadd.xlane.f32.xlu1 %v2782_v36 }
 0x592   : > { %1484 = vperm.xlu1 %2723, %v3990_v16  }
 0x593   : > { %1489 = vperm.xlu0 %2724, %v3992_v21  }
 0x5cd   : > { %v1334_v61 = vpop.xlane.xlu0 %1333 }
 0x5ce   : > { %v1364_v60 = vadd.f32 %v1334_v61, %v1316_v49  ;;  %v1332_v9 = vpop.xlane.xlu1 %1331  ;;  %v1327_v61 = vmul.f32 %v3965_v48, %v1311_v31  ;;  %v1408_v31 = vld [vmem:[#allocation5 + $0x60] sm:$0xff] }
 0x5cf   : > { %v1363_v62 = vadd.f32 %v1332_v9, %v1315_v50  ;;  %v1326_v50 = vmul.f32 %v3953_v22, %v1310_v45 }
 0x5d0   : > { %1381 = vst.msk [vmem:[#allocation4 + $0x8] sm:$0xff] %vm1379_vm1, %v1364_v60 }
 0x5d1   : > { %1380 = vst.msk [vmem:[#allocation4] sm:$0xff] %vm1379_vm1, %v1363_v62 }
 0x5d2   : > { %v1338_v1 = vpop.xlane.xlu1 %1337 }
 0x5d3   : > { %v1366_v4 = vadd.f32 %v1338_v1, %v1318_v11  ;;  %v1329_v11 = vmul.f32 %v3990_v16, %v1313_v10  ;;  %v1328_v1 = vmul.f32 %v3959_v39, %v1312_v46 }
 0x5d5   : > { %1383 = vst.msk [vmem:[#allocation4 + $0x18] sm:$0xff] %vm1379_vm1, %v1366_v4 }
 0x5d6   : > { %v1336_v19 = vpop.xlane.xlu0 %1335 }
 0x5d7   : > { %v1365_v63 = vadd.f32 %v1336_v19, %v1317_v40  ;;  %v1314_v40 = vld [vmem:[#allocation4 + $0x78] sm:$0xff] }
 0x5d8   : > { %v1330_v22 = vmul.f32 %v3992_v21, %v1314_v40  ;;  %v1495_v21 = vmul.f32 %v4000_v6, %v1399_v13  ;;  %v1407_v6 = vld [vmem:[#allocation5 + $0x58] sm:$0xff] }
 0x5d9   : > { %1382 = vst.msk [vmem:[#allocation4 + $0x10] sm:$0xff] %vm1379_vm1, %v1365_v63 }
 0x5e2   : > { %v1340_v23 = vpop.xlane.xlu0 %1339 }
 0x5e3   : > { %v1367_v26 = vadd.f32 %v1340_v23, %v1319_v0  ;;  %v1397_v0 = vld [vmem:[#allocation5 + $0x8] sm:$0xff]  ;;  %v1396_v23 = vld [vmem:[#allocation5] sm:$0xff] }
 0x5e4   : > { %v1493_v16 = vmul.f32 %v3998_v20, %v1397_v0  ;;  %v1492_v39 = vmul.f32 %v3996_v38, %v1396_v23  ;;  %v1405_v20 = vld [vmem:[#allocation5 + $0x48] sm:$0xff]  ;;  %v1404_v38 = vld [vmem:[#allocation5 + $0x40] sm:$0xff] }
 0x5e5   : > { %1384 = vst.msk [vmem:[#allocation4 + $0x20] sm:$0xff] %vm1379_vm1, %v1367_v26 }
 0x5ec   : > { %v1709_v13 = vld [vmem:[#allocation4 + $0x20] sm:$0xff] (!%p2117_p12) }
 0x5f6   : > { %v1342_v55 = vpop.xlane.xlu1 %1341 }
 0x5f7   : > { %v1368_v15 = vadd.f32 %v1342_v55, %v1320_v30 }
 0x5f9   : > { %1385 = vst.msk [vmem:[#allocation4 + $0x28] sm:$0xff] %vm1379_vm1, %v1368_v15  ;;  %v1398_v15 = vld [vmem:[#allocation5 + $0x10] sm:$0xff] }
 0x5fa   : > { %v1344_v28 = vpop.xlane.xlu0 %1343 }
 0x5fb   : > { %v1369_v2 = vadd.f32 %v1344_v28, %v1321_v24  ;;  %v1494_v24 = vmul.f32 %v4002_v7, %v1398_v15  ;;  %v1406_v7 = vld [vmem:[#allocation5 + $0x50] sm:$0xff] }
 0x5fd   : > { %1386 = vst.msk [vmem:[#allocation4 + $0x30] sm:$0xff] %vm1379_vm1, %v1369_v2 }
 0x5fe   : > { %v1348_v58 = vpop.xlane.xlu0 %1347  ;;  %v1346_v33 = vpop.xlane.xlu1 %1345 }
 0x5ff   : > { %v1371_v36 = vadd.f32 %v1348_v58, %v1323_v44  ;;  %v1370_v57 = vadd.f32 %v1346_v33, %v1322_v32  ;;  %v1501_v44 = vmul.f32 %v4012_v18, %v1405_v20  ;;  %v1500_v32 = vmul.f32 %v4014_v27, %v1404_v38 }
 0x601   : > { %1388 = vst.msk [vmem:[#allocation4 + $0x40] sm:$0xff] %vm1379_vm1, %v1371_v36  ;;  %1387 = vst.msk [vmem:[#allocation4 + $0x38] sm:$0xff] %vm1379_vm1, %v1370_v57  ;;  %v1401_v36 = vld [vmem:[#allocation5 + $0x28] sm:$0xff]  ;;  %v1503_v57 = vmul.f32 %v4016_v56, %v1407_v6  ;;  %v1504_v56 = vmul.f32 %v4022_v59, %v1408_v31  ;;  %v1402_v59 = vld [vmem:[#allocation5 + $0x30] sm:$0xff] }
 0x602   : > { %v1352_v25 = vpop.xlane.xlu0 %1351  ;;  %v1350_v37 = vpop.xlane.xlu1 %1349  ;;  %v1497_v27 = vmul.f32 %v4004_v47, %v1401_v36 }
 0x603   : > { %v1373_v49 = vadd.f32 %v1352_v25, %v1325_v29  ;;  %v1372_v41 = vadd.f32 %v1350_v37, %v1324_v54  ;;  %v1400_v29 = vld [vmem:[#allocation5 + $0x20] sm:$0xff]  ;;  %v1409_v54 = vld [vmem:[#allocation5 + $0x68] sm:$0xff]  ;;  %v1502_v25 = vmul.f32 %v4018_v42, %v1406_v7 }
 0x605   : > { %1390 = vst.msk [vmem:[#allocation4 + $0x50] sm:$0xff] %vm1379_vm1, %v1373_v49  ;;  %1389 = vst.msk [vmem:[#allocation4 + $0x48] sm:$0xff] %vm1379_vm1, %v1372_v41  ;;  %v1496_v41 = vmul.f32 %v4006_v5, %v1400_v29 }
 0x606   : > { %v1356_v60 = vpop.xlane.xlu0 %1355  ;;  %v1354_v9 = vpop.xlane.xlu1 %1353 }
 0x607   : > { %v1375_v62 = vadd.f32 %v1356_v60, %v1327_v61  ;;  %v1374_v34 = vadd.f32 %v1354_v9, %v1326_v50  ;;  %v1505_v61 = vmul.f32 %v4020_v43, %v1409_v54  ;;  %v1411_v9 = vld [vmem:[#allocation5 + $0x78] sm:$0xff] }
 0x608   : > { %v1403_v43 = vld [vmem:[#allocation5 + $0x38] sm:$0xff] }
 0x609   : > { %1392 = vst.msk [vmem:[#allocation4 + $0x60] sm:$0xff] %vm1379_vm1, %v1375_v62  ;;  %1391 = vst.msk [vmem:[#allocation4 + $0x58] sm:$0xff] %vm1379_vm1, %v1374_v34  ;;  %v1410_v62 = vld [vmem:[#allocation5 + $0x70] sm:$0xff]  ;;  %v1712_v15 = vld [vmem:[#allocation4 + $0x38] sm:$0xff] (!%p2117_p12) }
 0x60a   : > { %v1360_v12 = vpop.xlane.xlu0 %1359  ;;  %v1358_v4 = vpop.xlane.xlu1 %1357 }
 0x60b   : > { %v1377_v48 = vadd.f32 %v1360_v12, %v1329_v11  ;;  %v1376_v19 = vadd.f32 %v1358_v4, %v1328_v1 }
 0x60d   : > { %1394 = vst.msk [vmem:[#allocation4 + $0x70] sm:$0xff] %vm1379_vm1, %v1377_v48  ;;  %1393 = vst.msk [vmem:[#allocation4 + $0x68] sm:$0xff] %vm1379_vm1, %v1376_v19 }
 0x60e   : > { %v1362_v63 = vpop.xlane.xlu1 %1361 }
 0x60f   : > { %v1378_v35 = vadd.f32 %v1362_v63, %v1330_v22  ;;  %v1499_v63 = vmul.f32 %v4008_v8, %v1403_v43  ;;  %v1706_v8 = vld [vmem:[#allocation4 + $0x8] sm:$0xff] (!%p2117_p12)  ;;  %v1870_v43 = vld [vmem:[%s3565_s21 + $0x18] sm:$0xff] (!%p2117_p12) }
 0x610   : > { %v1716_v38 = vld [vmem:[#allocation4 + $0x58] sm:$0xff] (!%p2117_p12) }
 0x611   : > { %1395 = vst.msk [vmem:[#allocation4 + $0x78] sm:$0xff] %vm1379_vm1, %v1378_v35  ;;  %v1498_v35 = vmul.f32 %v4010_v14, %v1402_v59  ;;  %v1710_v14 = vld [vmem:[#allocation4 + $0x28] sm:$0xff] (!%p2117_p12) }
 0x612   : > { %v1490_v50 = vpop.permute.xlu0 %1489  ;;  %v1485_v34 = vpop.permute.xlu1 %1484 }
 0x613   : > { %v1507_v5 = vmul.f32 %v1490_v50, %v1411_v9  ;;  %v1506_v4 = vmul.f32 %v1485_v34, %v1410_v62 }
 0x615   : > { %v2366_v26 = vpop.f32.mrb[32].mxu0 }
 0x616   : > { %v1654_v3 = vadd.f32 %v2366_v26, %v1493_v16  ;;  %v1574_v30 = vpop.f32.mrb[33].mxu0  ;;  %v1707_v26 = vld [vmem:[#allocation4 + $0x10] sm:$0xff] (!%p2117_p12) }
 0x617   : > { %v1653_v55 = vadd.f32 %v1574_v30, %v1492_v39  ;;  %v1708_v30 = vld [vmem:[#allocation4 + $0x18] sm:$0xff] (!%p2117_p12)  ;;  %2791 = vrcp.f32 (!%p2117_p12), %v1707_v26 }
 0x618   : > { %1670 = vst [vmem:[#allocation5 + $0x8] sm:$0xff] %v1654_v3  ;;  %v1705_v3 = vld [vmem:[#allocation4] sm:$0xff] (!%p2117_p12)  ;;  %v1720_v7 = vld [vmem:[#allocation4 + $0x78] sm:$0xff] (!%p2117_p12) }
 0x619   : > { %1669 = vst [vmem:[#allocation5] sm:$0xff] %v1653_v55  ;;  %v3165_v55 = vmov (!%p2117_p12), 0   ;;  %2793 = vrcp.f32 (!%p2117_p12), %v1705_v3 }
 0x61a   : > { %2790 = vset.pattern.permute.xlu1 (!%p2117_p12), %v3165_v55  ;;  %2789 = vset.pattern.permute.xlu0 (!%p2117_p12), %v3165_v55  ;;  %2795 = vrcp.f32 (!%p2117_p12), %v1708_v30  ;;  %v1871_v55 = vld [vmem:[%s3565_s21 + $0x20] sm:$0xff] (!%p2117_p12) }
 0x61b   : > { %2797 = vrcp.f32 (!%p2117_p12), %v1706_v8 }
 0x61c   : > { %2799 = vrcp.f32 (!%p2117_p12), %v1710_v14 }
 0x61d   : > { %v2369_v28 = vpop.f32.mrb[34].mxu0  ;;  %2801 = vrcp.f32 (!%p2117_p12), %v1709_v13 }
 0x61e   : > { %v1656_v51 = vadd.f32 %v2369_v28, %v1495_v21  ;;  %v1584_v52 = vpop.f32.mrb[35].mxu0  ;;  %v1711_v21 = vld [vmem:[#allocation4 + $0x30] sm:$0xff] (!%p2117_p12)  ;;  %2803 = vrcp.f32 (!%p2117_p12), %v1712_v15 }
 0x61f   : > { %v1655_v2 = vadd.f32 %v1584_v52, %v1494_v24  ;;  %2805 = vrcp.f32 (!%p2117_p12), %v1711_v21  ;;  %v1739_v62 = vld [vmem:[#allocation5 + $0x8] sm:$0xff] (!%p2117_p12) }
 0x620   : > { %1672 = vst [vmem:[#allocation5 + $0x18] sm:$0xff] %v1656_v51  ;;  %v1714_v51 = vld [vmem:[#allocation4 + $0x48] sm:$0xff] (!%p2117_p12) }
 0x621   : > { %1671 = vst [vmem:[#allocation5 + $0x10] sm:$0xff] %v1655_v2  ;;  %v2792_v24 = vpop.eup (!%p2117_p12), %2791  ;;  %v1713_v2 = vld [vmem:[#allocation4 + $0x40] sm:$0xff] (!%p2117_p12)  ;;  %2807 = vrcp.f32 (!%p2117_p12), %v1714_v51  ;;  %v1874_v51 = vld [vmem:[%s3565_s21 + $0x38] sm:$0xff] (!%p2117_p12) }
 0x622   : > { %1766 = vperm.xlu1 (!%p2117_p12), %2790, %v2792_v24   ;;  %2809 = vrcp.f32 (!%p2117_p12), %v1713_v2 }
 0x623   : > { %v2794_v28 = vpop.eup (!%p2117_p12), %2793  ;;  %2811 = vrcp.f32 (!%p2117_p12), %v1716_v38  ;;  %v1873_v38 = vld [vmem:[%s3565_s21 + $0x30] sm:$0xff] (!%p2117_p12) }
 0x624   : > { %v2796_v52 = vpop.eup (!%p2117_p12), %2795  ;;  %1756 = vperm.xlu0 (!%p2117_p12), %2789, %v2794_v28  }
 0x625   : > { %v2798_v20 = vpop.eup (!%p2117_p12), %2797 }
 0x626   : > { %1771 = vperm.xlu1 (!%p2117_p12), %2790, %v2796_v52  }
 0x628   : > { %1761 = vperm.xlu0 (!%p2117_p12), %2789, %v2798_v20  }
 0x631   : > { %v2378_v58 = vpop.f32.mrb[16].mxu1 }
 0x632   : > { %v1662_v33 = vadd.f32 %v2378_v58, %v1501_v44  ;;  %v1614_v17 = vpop.f32.mrb[17].mxu1  ;;  %v2800_v44 = vpop.eup (!%p2117_p12), %2799 }
 0x633   : > { %v1661_v53 = vadd.f32 %v1614_v17, %v1500_v32  ;;  %v1715_v32 = vld [vmem:[#allocation4 + $0x50] sm:$0xff] (!%p2117_p12)  ;;  %v2802_v58 = vpop.eup (!%p2117_p12), %2801  ;;  %1781 = vperm.xlu1 (!%p2117_p12), %2790, %v2800_v44  }
 0x634   : > { %1678 = vst [vmem:[#allocation5 + $0x48] sm:$0xff] %v1662_v33  ;;  %2813 = vrcp.f32 (!%p2117_p12), %v1715_v32  ;;  %v1718_v33 = vld [vmem:[#allocation4 + $0x68] sm:$0xff] (!%p2117_p12)  ;;  %v2804_v17 = vpop.eup (!%p2117_p12), %2803  ;;  %1776 = vperm.xlu0 (!%p2117_p12), %2789, %v2802_v58  }
 0x635   : > { %1677 = vst [vmem:[#allocation5 + $0x40] sm:$0xff] %v1661_v53  ;;  %v1717_v53 = vld [vmem:[#allocation4 + $0x60] sm:$0xff] (!%p2117_p12)  ;;  %v2806_v6 = vpop.eup (!%p2117_p12), %2805  ;;  %2815 = vrcp.f32 (!%p2117_p12), %v1718_v33 }
 0x636   : > { %2817 = vrcp.f32 (!%p2117_p12), %v1717_v53  ;;  %v2808_v36 = vpop.eup (!%p2117_p12), %2807 }
 0x637   : > { %1791 = vperm.xlu1 (!%p2117_p12), %2790, %v2804_v17   ;;  %v2810_v29 = vpop.eup (!%p2117_p12), %2809  ;;  %2819 = vrcp.f32 (!%p2117_p12), %v1720_v7  ;;  %v1876_v7 = vld [vmem:[%s3565_s21 + $0x48] sm:$0xff] (!%p2117_p12) }
 0x638   : > { %1786 = vperm.xlu0 (!%p2117_p12), %2789, %v2806_v6   ;;  %v2812_v54 = vpop.eup (!%p2117_p12), %2811 }
 0x639   : > { %v2381_v37 = vpop.f32.mrb[18].mxu1 }
 0x63a   : > { %v1664_v18 = vadd.f32 %v2381_v37, %v1503_v57  ;;  %v1624_v45 = vpop.f32.mrb[19].mxu1  ;;  %v1719_v57 = vld [vmem:[#allocation4 + $0x70] sm:$0xff] (!%p2117_p12) }
 0x63b   : > { %v1663_v49 = vadd.f32 %v1624_v45, %v1502_v25  ;;  %1801 = vperm.xlu1 (!%p2117_p12), %2790, %v2808_v36   ;;  %2821 = vrcp.f32 (!%p2117_p12), %v1719_v57  ;;  %v1747_v2 = vld [vmem:[#allocation5 + $0x48] sm:$0xff] (!%p2117_p12) }
 0x63c   : > { %1680 = vst [vmem:[#allocation5 + $0x58] sm:$0xff] %v1664_v18  ;;  %v2372_v60 = vpop.f32.mrb[36].mxu0  ;;  %1796 = vperm.xlu0 (!%p2117_p12), %2789, %v2810_v29   ;;  %v1746_v44 = vld [vmem:[#allocation5 + $0x40] sm:$0xff] (!%p2117_p12) }
 0x63d   : > { %1679 = vst [vmem:[#allocation5 + $0x50] sm:$0xff] %v1663_v49  ;;  %v1658_v10 = vadd.f32 %v2372_v60, %v1497_v27  ;;  %v1594_v42 = vpop.f32.mrb[37].mxu0  ;;  %v2384_v46 = vpop.f32.mrb[20].mxu1  ;;  %v1740_v27 = vld [vmem:[#allocation5 + $0x10] sm:$0xff] (!%p2117_p12)  ;;  %v1738_v49 = vld [vmem:[#allocation5] sm:$0xff] (!%p2117_p12) }
 0x63e   : > { %v1657_v11 = vadd.f32 %v1594_v42, %v1496_v41  ;;  %v1666_v1 = vadd.f32 %v2384_v46, %v1505_v61  ;;  %v1634_v47 = vpop.f32.mrb[21].mxu1  ;;  %v2814_v25 = vpop.eup (!%p2117_p12), %2813  ;;  %v4071_v41 = vstv (!%p2117_p12), %s1737_s18  ;;  %v1867_v46 = vld [vmem:[%s3565_s21] sm:$0xff] (!%p2117_p12) }
 0x63f   : > { %1674 = vst [vmem:[#allocation5 + $0x28] sm:$0xff] %v1658_v10  ;;  %v1665_v12 = vadd.f32 %v1634_v47, %v1504_v56  ;;  %1811 = vperm.xlu1 (!%p2117_p12), %2790, %v2812_v54   ;;  %v2816_v37 = vpop.eup (!%p2117_p12), %2815  ;;  %v1869_v56 = vld [vmem:[%s3565_s21 + $0x10] sm:$0xff] (!%p2117_p12)  ;;  %v1741_v10 = vld [vmem:[#allocation5 + $0x18] sm:$0xff] (!%p2117_p12)  ;;  %v1875_v54 = vld [vmem:[%s3565_s21 + $0x40] sm:$0xff] (!%p2117_p12) }
 0x640   : > { %1673 = vst [vmem:[#allocation5 + $0x20] sm:$0xff] %v1657_v11  ;;  %1682 = vst [vmem:[#allocation5 + $0x68] sm:$0xff] %v1666_v1  ;;  %1806 = vperm.xlu0 (!%p2117_p12), %2789, %v2814_v25   ;;  %v2818_v31 = vpop.eup (!%p2117_p12), %2817 }
 0x641   : > { %1681 = vst [vmem:[#allocation5 + $0x60] sm:$0xff] %v1665_v12  ;;  %v2387_v40 = vpop.f32.mrb[22].mxu1  ;;  %v2820_v18 = vpop.eup (!%p2117_p12), %2819 }
 0x642   : > { %v1668_v48 = vadd.f32 %v2387_v40, %v1507_v5  ;;  %v1644_v19 = vpop.f32.mrb[23].mxu1 }
 0x643   : > { %v1667_v22 = vadd.f32 %v1644_v19, %v1506_v4  ;;  %1704 = sbr.rel (%p2117_p12) target bundleno = 1743 (0x6cf), region = 80  ;;  %1821 = vperm.xlu1 (!%p2117_p12), %2790, %v2816_v37   ;;  %v1749_v57 = vld [vmem:[#allocation5 + $0x58] sm:$0xff] (!%p2117_p12) }
 0x644   : > { %1684 = vst [vmem:[#allocation5 + $0x78] sm:$0xff] %v1668_v48  ;;  %1816 = vperm.xlu0 (!%p2117_p12), %2789, %v2818_v31   ;;  %v1868_v48 = vld [vmem:[%s3565_s21 + $0x8] sm:$0xff] (!%p2117_p12)  ;;  %v1748_v25 = vld [vmem:[#allocation5 + $0x50] sm:$0xff] (!%p2117_p12) }
 0x645   : > { %1683 = vst [vmem:[#allocation5 + $0x70] sm:$0xff] %v1667_v22  ;;  %v2375_v0 = vpop.f32.mrb[38].mxu0  ;;  %v2822_v45 = vpop.eup (!%p2117_p12), %2821 }
 0x646   : > { %v1660_v23 = vadd.f32 %v2375_v0, %v1499_v63  ;;  %v1604_v16 = vpop.f32.mrb[39].mxu0  ;;  %v1743_v40 = vld [vmem:[#allocation5 + $0x28] sm:$0xff] (!%p2117_p12) }
 0x647   : > { %v1659_v39 = vadd.f32 %v1604_v16, %v1498_v35  ;;  %1831 = vperm.xlu1 (!%p2117_p12), %2790, %v2820_v18   ;;  %v1742_v19 = vld [vmem:[#allocation5 + $0x20] sm:$0xff] (!%p2117_p12) }
 0x648   : > { %1676 = vst [vmem:[#allocation5 + $0x38] sm:$0xff] %v1660_v23  ;;  %1826 = vperm.xlu0 (!%p2117_p12), %2789, %v2822_v45  }
 0x649   : > { %1675 = vst [vmem:[#allocation5 + $0x30] sm:$0xff] %v1659_v39  ;;  %v1872_v39 = vld [vmem:[%s3565_s21 + $0x28] sm:$0xff] (!%p2117_p12) }
 0x64f   : > { %v1745_v3 = vld [vmem:[#allocation5 + $0x38] sm:$0xff] }
 0x650   : > { %v1744_v8 = vld [vmem:[#allocation5 + $0x30] sm:$0xff] }
 0x6a1   : > { %v1767_v61 = vpop.permute.xlu1 %1766 }
 0x6a2   : > { %v1836_v50 = vmul.f32 %v1767_v61, %v1740_v27  ;;  %v1878_v61 = vld [vmem:[%s3565_s21 + $0x58] sm:$0xff] }
 0x6a3   : > { %v1757_v60 = vpop.permute.xlu0 %1756 }
 0x6a4   : > { %v1834_v9 = vmul.f32 %v1757_v60, %v1738_v49  ;;  %v1853_v42 = vmul.f32 %v4071_v41, %v1836_v50  ;;  %v1751_v60 = vld [vmem:[#allocation5 + $0x68] sm:$0xff] }
 0x6a5   : > { %v1772_v11 = vpop.permute.xlu1 %1771 }
 0x6a6   : > { %v1851_v34 = vmul.f32 %v4071_v41, %v1834_v9  ;;  %v1885_v1 = vadd.f32 %v1869_v56, %v1853_v42  ;;  %v1837_v47 = vmul.f32 %v1772_v11, %v1741_v10  ;;  %v1877_v9 = vld [vmem:[%s3565_s21 + $0x50] sm:$0xff]  ;;  %v1750_v10 = vld [vmem:[#allocation5 + $0x60] sm:$0xff] }
 0x6a7   : > { %v1762_v12 = vpop.permute.xlu0 %1761 }
 0x6a8   : > { %v1883_v5 = vadd.f32 %v1867_v46, %v1851_v34  ;;  %v1835_v4 = vmul.f32 %v1762_v12, %v1739_v62  ;;  %1901 = vst [vmem:[%s3591_s26 + $0x10] sm:$0xff] %v1885_v1  ;;  %v1854_v59 = vmul.f32 %v4071_v41, %v1837_v47  ;;  %v1880_v47 = vld [vmem:[%s3565_s21 + $0x68] sm:$0xff] }
 0x6aa   : > { %1899 = vst [vmem:[%s3591_s26] sm:$0xff] %v1883_v5  ;;  %v1852_v22 = vmul.f32 %v4071_v41, %v1835_v4  ;;  %v1886_v35 = vadd.f32 %v1870_v43, %v1854_v59  ;;  %v1753_v5 = vld [vmem:[#allocation5 + $0x78] sm:$0xff]  ;;  %v1879_v4 = vld [vmem:[%s3565_s21 + $0x60] sm:$0xff] }
 0x6ac   : > { %v1884_v16 = vadd.f32 %v1868_v48, %v1852_v22  ;;  %1902 = vst [vmem:[%s3591_s26 + $0x18] sm:$0xff] %v1886_v35 }
 0x6ae   : > { %1900 = vst [vmem:[%s3591_s26 + $0x8] sm:$0xff] %v1884_v16 }
 0x6b2   : > { %v1782_v63 = vpop.permute.xlu1 %1781 }
 0x6b3   : > { %v1839_v0 = vmul.f32 %v1782_v63, %v1743_v40  ;;  %v1777_v23 = vpop.permute.xlu0 %1776  ;;  %v1752_v40 = vld [vmem:[#allocation5 + $0x70] sm:$0xff] }
 0x6b4   : > { %v1838_v26 = vmul.f32 %v1777_v23, %v1742_v19 }
 0x6b5   : > { %v1856_v30 = vmul.f32 %v4071_v41, %v1839_v0  ;;  %v1882_v0 = vld [vmem:[%s3565_s21 + $0x78] sm:$0xff] }
 0x6b6   : > { %v1855_v14 = vmul.f32 %v4071_v41, %v1838_v26  ;;  %v1792_v13 = vpop.permute.xlu1 %1791 }
 0x6b7   : > { %v1888_v15 = vadd.f32 %v1872_v39, %v1856_v30  ;;  %v1841_v21 = vmul.f32 %v1792_v13, %v1745_v3  ;;  %v1787_v24 = vpop.permute.xlu0 %1786  ;;  %v1881_v39 = vld [vmem:[%s3565_s21 + $0x70] sm:$0xff] }
 0x6b8   : > { %v1887_v28 = vadd.f32 %v1871_v55, %v1855_v14  ;;  %v1840_v52 = vmul.f32 %v1787_v24, %v1744_v8 }
 0x6b9   : > { %1904 = vst [vmem:[%s3591_s26 + $0x28] sm:$0xff] %v1888_v15  ;;  %v1858_v20 = vmul.f32 %v4071_v41, %v1841_v21 }
 0x6ba   : > { %1903 = vst [vmem:[%s3591_s26 + $0x20] sm:$0xff] %v1887_v28  ;;  %v1857_v32 = vmul.f32 %v4071_v41, %v1840_v52  ;;  %v1802_v58 = vpop.permute.xlu1 %1801 }
 0x6bb   : > { %v1890_v33 = vadd.f32 %v1874_v51, %v1858_v20  ;;  %v1843_v17 = vmul.f32 %v1802_v58, %v1747_v2  ;;  %v1797_v53 = vpop.permute.xlu0 %1796 }
 0x6bc   : > { %v1889_v6 = vadd.f32 %v1873_v38, %v1857_v32  ;;  %v1842_v36 = vmul.f32 %v1797_v53, %v1746_v44 }
 0x6bd   : > { %1906 = vst [vmem:[%s3591_s26 + $0x38] sm:$0xff] %v1890_v33  ;;  %v1860_v29 = vmul.f32 %v4071_v41, %v1843_v17 }
 0x6be   : > { %1905 = vst [vmem:[%s3591_s26 + $0x30] sm:$0xff] %v1889_v6  ;;  %v1859_v37 = vmul.f32 %v4071_v41, %v1842_v36  ;;  %v1812_v31 = vpop.permute.xlu1 %1811 }
 0x6bf   : > { %v1892_v18 = vadd.f32 %v1876_v7, %v1860_v29  ;;  %v1845_v45 = vmul.f32 %v1812_v31, %v1749_v57  ;;  %v1807_v27 = vpop.permute.xlu0 %1806 }
 0x6c0   : > { %v1891_v49 = vadd.f32 %v1875_v54, %v1859_v37  ;;  %v1844_v50 = vmul.f32 %v1807_v27, %v1748_v25 }
 0x6c1   : > { %1908 = vst [vmem:[%s3591_s26 + $0x48] sm:$0xff] %v1892_v18  ;;  %v1862_v56 = vmul.f32 %v4071_v41, %v1845_v45 }
 0x6c2   : > { %1907 = vst [vmem:[%s3591_s26 + $0x40] sm:$0xff] %v1891_v49  ;;  %v1861_v42 = vmul.f32 %v4071_v41, %v1844_v50  ;;  %v1822_v46 = vpop.permute.xlu1 %1821 }
 0x6c3   : > { %v1894_v62 = vadd.f32 %v1878_v61, %v1862_v56  ;;  %v1847_v34 = vmul.f32 %v1822_v46, %v1751_v60  ;;  %v1817_v11 = vpop.permute.xlu0 %1816 }
 0x6c4   : > { %v1893_v1 = vadd.f32 %v1877_v9, %v1861_v42  ;;  %v1846_v12 = vmul.f32 %v1817_v11, %v1750_v10 }
 0x6c5   : > { %1910 = vst [vmem:[%s3591_s26 + $0x58] sm:$0xff] %v1894_v62  ;;  %v1864_v43 = vmul.f32 %v4071_v41, %v1847_v34 }
 0x6c6   : > { %1909 = vst [vmem:[%s3591_s26 + $0x50] sm:$0xff] %v1893_v1  ;;  %v1863_v59 = vmul.f32 %v4071_v41, %v1846_v12  ;;  %v1832_v48 = vpop.permute.xlu1 %1831 }
 0x6c7   : > { %v1896_v19 = vadd.f32 %v1880_v47, %v1864_v43  ;;  %v1849_v22 = vmul.f32 %v1832_v48, %v1753_v5  ;;  %v1827_v63 = vpop.permute.xlu0 %1826 }
 0x6c8   : > { %v1895_v35 = vadd.f32 %v1879_v4, %v1863_v59  ;;  %v1848_v23 = vmul.f32 %v1827_v63, %v1752_v40 }
 0x6c9   : > { %1912 = vst [vmem:[%s3591_s26 + $0x68] sm:$0xff] %v1896_v19  ;;  %v1866_v16 = vmul.f32 %v4071_v41, %v1849_v22 }
 0x6ca   : > { %1911 = vst [vmem:[%s3591_s26 + $0x60] sm:$0xff] %v1895_v35  ;;  %v1865_v26 = vmul.f32 %v4071_v41, %v1848_v23 }
 0x6cb   : > { %v1898_v3 = vadd.f32 %v1882_v0, %v1866_v16 }
 0x6cc   : > { %v1897_v30 = vadd.f32 %v1881_v39, %v1865_v26 }
 0x6cd   : > { %1914 = vst [vmem:[%s3591_s26 + $0x78] sm:$0xff] %v1898_v3 }
 0x6ce   : > { %1913 = vst [vmem:[%s3591_s26 + $0x70] sm:$0xff] %v1897_v30 }
 0x6cf PF: > { %s4277_s16 = sld [smem:[#allocation27_spill]]  ;;  %s4278_s29 = sld [smem:[#allocation28_spill]] }
 0x6d0   : > { %s1931_s4 = sshll.u32 %s3591_s26, 4  ;;  %s4279_s7 = sld [smem:[#allocation38_spill]]  ;;  %s4124_s4 = int_to_ptr.vmem [resolvable:$true] %s1931_s4 }
 0x6d1   : > { %s1916_s20 = scalar_lea.sflag [#allocation9], %s3561_s9  ;;  %s2995_s2 = scalar_lea.vmem %s4124_s4, 2048 }
 0x6d2   : > { %p2996_p5 = scmp.ne.s32.totalorder %s4124_s4, %s2995_s2  ;;  %p4280_p0 = scmp.ne.s32.totalorder %s4255_s23, 0 }
 0x6d3   : > { %s3166_s15 = smov [#allocation18]  }
 0x6d4   : > { %p2997_p3 = pnand %p2996_p5, %p4280_p0  ;;  %s2999_s26 = sshll.u32 %s3166_s15, 4  ;;  %s3000_s26 = int_to_ptr.vmem [resolvable:$false] %s2999_s26 }
 0x6d5   : > { %s2119_s5 = sshll.u32 %s4277_s16, 4  ;;  %s2120_s17 = sshll.u32 %s4278_s29, 5 }
 0x6d6   : > { %s1928_s25 = sadd.s32 %s2120_s17, %s2119_s5  ;;  %p2998_p4 = pneg %p2997_p3 }
 0x6d7   : > { %s2121_s21 = sshll.u32 %s1928_s25, 7  ;;  %s3001_s18 = scalar_lea.vmem %s3000_s26, 4096 }
 0x6d8   : > { %s4129_s22 = scalar_lea.hbm %s4279_s7, %s2121_s21  ;;  %p3002_p10 = scmp.lt.s32.totalorder %s4124_s4, %s3000_s26 }
 0x6d9   : > { %p3003_p6 = scmp.lt.s32.totalorder %s3001_s18, %s2995_s2 }
 0x6db   : > { %p3004_p9 = por %p3003_p6, %p3002_p10 }
 0x6dd   : > { %p3005_p2 = pnand %p3004_p9, %p2998_p4 }
 0x6df   : > { %3008 = shalt.err (!%p3005_p2)
}
 0x6e0   : > { %s3009_s16 = scalar_lea.hbm %s4129_s22, 2048  ;;  %s3013_s17 = scalar_lea.hbm %s4279_s7, 8192 }
 0x6e1   : > { %p3010_p11 = scmp.ne.s32.totalorder %s4129_s22, %s3009_s16  ;;  %p3014_p1 = scmp.lt.u32.totalorder %s4129_s22, %s4279_s7 }
 0x6e2   : > { %p3015_p8 = scmp.lt.u32.totalorder %s3013_s17, %s3009_s16  ;;  %p3017_p5 = scmp.lt.u32.totalorder %s3009_s16, %s4129_s22 }
 0x6e3   : > { %p3011_p13 = pnand %p3010_p11, %p4280_p0 }
 0x6e4   : > { %p3016_p12 = por %p3015_p8, %p3014_p1 }
 0x6e5   : > { %p3012_p7 = pneg %p3011_p13 }
 0x6e6   : > { %p3018_p3 = por %p3017_p5, %p3016_p12 }
 0x6e8   : > { %p3019_p4 = pnand %p3018_p3, %p3012_p7 }
 0x6ea   : > { %3022 = shalt.err (!%p3019_p4)
}
 0x6eb   : > { %s3167_s10 = smov 128   ;;  %s3168_s19 = smov 8  }
 0x6ec   : > { %2568 = dma.vmem_to_hbm [thread:$0]  (%p4280_p0), %s4124_s4, 2048, %s4129_s22, %s1916_s20, %s3167_s10, %s3167_s10, %s3168_s19  }
 0x6ed PF: > { %s4281_s2 = sld [smem:[#allocation25_spill]]  ;;  %p2603_p10 = scmp.ge.s32.totalorder %s3149_s14, 2 }
 0x6ee   : > { %p4282_p6 = scmp.ne.s32.totalorder %s4257_s6, 0 }
 0x6f0   : > { %p2591_p9 = pnand %p2603_p10, %p4282_p6 }
 0x6f3   : > { %s1946_s15 = sand.u32 1, %s4281_s2  }
 0x6f4   : > { %s1947_s26 = scalar_lea.sflag [#allocation9], %s1946_s15 }
 0x6f5   : > { %3096 = dma.done.wait (!%p2591_p9), %s1947_s26, 2048  }
 0x6f6   : > { %3098 = vsyncadd (!%p2591_p9), %s1947_s26, 4294965248  ;;  %s29_s14 = sadd.s32 1, %s3149_s14   ;;  %s4284_s23 = sld [smem:[#allocation31_spill]] }
 0x6f7   : > { %p4160_p2 = scmp.ge.s32.totalorder %s29_s14, 10   ;;  %s4285_s4 = sld [smem:[#allocation32_spill]] }
 0x6f8   : > { %s4286_s22 = sld [smem:[#allocation33_spill]]  ;;  %s4287_s26 = smov %s3105_s27 }
 0x6f9   : > { %s4288_s27 = smov %s3109_s28  ;;  %s4289_s28 = smov %s3508_s24 }
 0x6fa   : > { %s4290_s29 = smov %s3117_s30  ;;  %s4291_s30 = smov %s3121_s8 }
 0x6fb   : > { %s4292_s8 = smov %s3449_s3  ;;  %s4293_s6 = smov %s3137_s11 }
 0x6fc   : > { %s4294_s9 = smov %s3141_s12  ;;  %s4295_s10 = smov %s3145_s13 }
 0x6fd   : > { %s4296_s11 = smov %s4284_s23  ;;  %s4297_s12 = smov %s4285_s4 }
 0x6fe   : > { %s4298_s13 = smov %s4286_s22  ;;  %28 = sbr.rel (!%p4160_p2) target bundleno = 21 (0x15), region = 130 }
 0x705   :  { %1952 = vsyncpa [#allocation8], 1 }
 0x706   :  { %1954 = vsyncpa [#allocation8 + $0x1], 1 }
 0x707   :  { %1955 = vsyncpa [#allocation11], 1 }
 0x708   :  { %1957 = vsyncpa [#allocation11 + $0x1], 1 }
 0x709   :  { %1958 = vsyncpa [#allocation14], 1 }
 0x70a   :  { %1959 = vsyncpa [#allocation17], 1 }
 0x70b   :  { %1960 = vsyncpa [#allocation9], 1 }
 0x70c   :  { %1962 = vsyncpa [#allocation9 + $0x1], 1 }

</bundles_post_ra>
